<compile_context>
chip_gen: v5e
topology: v5e:2x2
jax: 0.10.0
libtpu: 0.0.40
codegen_flags: <defaults>
</compile_context>

<pallas_src>
import math

import jax
import jax.numpy as jnp
from jax import lax
from jax.experimental import pallas as pl
from jax.experimental.pallas import tpu as pltpu

# Small synthetic config (consistent with the module's shape conventions).
T = 16          # sequence length
B = 2           # batch
C = 32          # embedding_dim
H = 4           # num_attention_heads
D = C // H      # head dim
FFN = 64        # ffn_embedding_dim
N = B * T       # total rows processed by the single kernel invocation
LN_EPS = 1e-5


def _layer_norm(x, gamma, beta):
    mean = jnp.mean(x, axis=-1, keepdims=True)
    var = jnp.mean((x - mean) ** 2, axis=-1, keepdims=True)
    return (x - mean) * lax.rsqrt(var + LN_EPS) * gamma + beta


def encoder_layer_kernel(
    x_ref,        # (N, C)        f32, batch-major rows (b*T + t)
    wqkv_ref,     # (C, 3C)       bf16  [wq*scale | wk | wv] lane-packed
    wo_ref,       # (C, C)        bf16
    w1_ref,       # (C, FFN)      bf16
    w2_ref,       # (FFN, C)      bf16
    sp_ref,       # (8, 128)      f32 packed small params (see wrapper)
    out_ref,      # (N, C)        f32
    heads_ref,    # (3, H*B, T, D) f32 VMEM scratch (head-split q/k/v)
    ctx_ref,      # (N, C)        f32 VMEM scratch (merged attention context)
):
    x = x_ref[...]                                    # (N, C) f32
    x_bf = x.astype(jnp.bfloat16)                     # cast once

    # --- unpack the (8, 128) small-parameter slab ---------------------------
    sp = sp_ref[...]
    bqkv = sp[0:1, 0:3 * C]                           # (1, 96)  [bq*scale|bk|bv]
    b1 = sp[1:2, 0:FFN]                               # (1, 64)
    bo = sp[2:3, 0:C]
    g1 = sp[3:4, 0:C]
    be1 = sp[4:5, 0:C]
    b2 = sp[5:6, 0:C]
    g2 = sp[6:7, 0:C]
    be2 = sp[7:8, 0:C]

    # --- fused Q/K/V projection: one lane-dense MXU dot ---------------------
    qkv = jnp.dot(x_bf, wqkv_ref[...],
                  preferred_element_type=jnp.float32) + bqkv      # (N, 3C) f32

    # --- split heads: static lane slices + leading-dim reshapes -> scratch --
    # heads_ref[which, h*B + b, t, d]; all slices/reshapes are layout-safe.
    for which in range(3):                            # q, k, v
        for h in range(H):
            off = which * C + h * D
            heads_ref[which, h * B:(h + 1) * B] = (
                qkv[:, off:off + D].reshape(B, T, D))

    q = heads_ref[0].astype(jnp.bfloat16)             # (H*B, T, D)
    k = heads_ref[1].astype(jnp.bfloat16)
    v = heads_ref[2].astype(jnp.bfloat16)

    # --- attention core, batched over all B*H heads at once -----------------
    s = jnp.einsum('btd,bsd->bts', q, k,
                   preferred_element_type=jnp.float32)            # (H*B, T, T)
    s = s - jnp.max(s, axis=-1, keepdims=True)
    p = jnp.exp(s)
    p = p * pl.reciprocal(jnp.sum(p, axis=-1, keepdims=True), approx=True)

    ctx = jnp.einsum('bts,bsd->btd', p.astype(jnp.bfloat16), v,
                     preferred_element_type=jnp.float32)          # (H*B, T, D)

    # --- merge heads back to lane-major (N, C) via scratch lane stores ------
    for h in range(H):
        ctx_ref[:, h * D:(h + 1) * D] = ctx[h * B:(h + 1) * B].reshape(N, D)

    # --- output projection: one dot ------------------------------------------
    attn_out = jnp.dot(ctx_ref[...].astype(jnp.bfloat16), wo_ref[...],
                       preferred_element_type=jnp.float32) + bo   # (N, C)

    # dropout1 == identity (eval)
    x1 = x + attn_out                                 # residual
    xn = _layer_norm(x1, g1, be1)                     # self_attn_layer_norm

    # --- feed-forward --------------------------------------------------------
    h1 = jnp.dot(xn.astype(jnp.bfloat16), w1_ref[...],
                 preferred_element_type=jnp.float32) + b1
    h1 = jnp.maximum(h1, 0.0)                         # relu activation_fn
    # dropout2 == identity
    ff = jnp.dot(h1.astype(jnp.bfloat16), w2_ref[...],
                 preferred_element_type=jnp.float32) + b2
    # dropout3 == identity
    x2 = xn + ff                                      # residual
    y = _layer_norm(x2, g2, be2)                      # final_layer_norm

    out_ref[...] = y.astype(out_ref.dtype)


def transformer_encoder_layer(x_tbc, params):
    """x_tbc: (T, B, C) float32. Returns (T, B, C)."""
    scaling = 1.0 / math.sqrt(D)

    # Batch-major rows so a single kernel invocation covers everything.
    x2d = jnp.transpose(x_tbc, (1, 0, 2)).reshape(N, C)

    # Fused QKV weight, lane-packed; scaling folded into the q columns/bias.
    wqkv = jnp.concatenate(
        [params["wq"] * scaling, params["wk"], params["wv"]],
        axis=1).astype(jnp.bfloat16)                                  # (C, 3C)
    wo = params["wo"].astype(jnp.bfloat16)                            # (C, C)
    w1 = params["w1"].astype(jnp.bfloat16)                            # (C, FFN)
    w2 = params["w2"].astype(jnp.bfloat16)                            # (FFN, C)

    # One lane-dense (8, 128) f32 slab for all small parameters.
    def pad_row(v, width=128):
        v = v.reshape(1, -1)
        return jnp.pad(v, ((0, 0), (0, width - v.shape[1])))

    bqkv_row = jnp.concatenate(
        [params["bq"] * scaling, params["bk"], params["bv"]], axis=1)  # (1, 96)
    sp = jnp.concatenate(
        [pad_row(bqkv_row), pad_row(params["b1"]),
         pad_row(params["bo"]), pad_row(params["g1"]), pad_row(params["be1"]),
         pad_row(params["b2"]), pad_row(params["g2"]), pad_row(params["be2"])],
        axis=0).astype(jnp.float32)                                   # (8, 128)

    def full_spec(shape):
        nd = len(shape)
        return pl.BlockSpec(shape, lambda i, nd=nd: (0,) * nd)

    out = pl.pallas_call(
        encoder_layer_kernel,
        out_shape=jax.ShapeDtypeStruct((N, C), jnp.float32),
        grid_spec=pltpu.PrefetchScalarGridSpec(
            num_scalar_prefetch=0,
            grid=(1,),
            in_specs=[
                full_spec((N, C)),
                full_spec((C, 3 * C)),
                full_spec((C, C)),
                full_spec((C, FFN)),
                full_spec((FFN, C)),
                full_spec((8, 128)),
            ],
            out_specs=full_spec((N, C)),
            scratch_shapes=[
                pltpu.VMEM((3, H * B, T, D), jnp.float32),
                pltpu.VMEM((N, C), jnp.float32),
            ],
        ),
        compiler_params=pltpu.CompilerParams(
            dimension_semantics=("arbitrary",)),
    )(x2d, wqkv, wo, w1, w2, sp)

    return jnp.transpose(out.reshape(B, T, C), (1, 0, 2))   # back to (T, B, C)


def init_params(key):
    ks = jax.random.split(key, 16)
    it = iter(ks)

    def rnd(shape, scale):
        return scale * jax.random.normal(next(it), shape, jnp.float32)

    p = {}
    p["wq"] = rnd((C, C), 0.05)
    p["wk"] = rnd((C, C), 0.05)
    p["wv"] = rnd((C, C), 0.05)
    p["wo"] = rnd((C, C), 0.05)
    p["bq"] = rnd((1, C), 0.02)
    p["bk"] = rnd((1, C), 0.02)
    p["bv"] = rnd((1, C), 0.02)
    p["bo"] = rnd((1, C), 0.02)
    p["g1"] = 1.0 + rnd((1, C), 0.05)
    p["be1"] = rnd((1, C), 0.02)
    p["w1"] = rnd((C, FFN), 0.05)
    p["b1"] = rnd((1, FFN), 0.02)
    p["w2"] = rnd((FFN, C), 0.05)
    p["b2"] = rnd((1, C), 0.02)
    p["g2"] = 1.0 + rnd((1, C), 0.05)
    p["be2"] = rnd((1, C), 0.02)
    return p


def reference(x_tbc, p):
    """Pure-JAX f32 reference of the same forward (post-norm, eval dropout)."""
    x = jnp.transpose(x_tbc, (1, 0, 2))               # (B, T, C)
    scaling = 1.0 / math.sqrt(D)
    q = (x @ p["wq"] + p["bq"]) * scaling
    k = x @ p["wk"] + p["bk"]
    v = x @ p["wv"] + p["bv"]
    qh = q.reshape(B, T, H, D)
    kh = k.reshape(B, T, H, D)
    vh = v.reshape(B, T, H, D)
    s = jnp.einsum("bthd,bshd->bhts", qh, kh)
    p_attn = jax.nn.softmax(s, axis=-1)
    ctx = jnp.einsum("bhts,bshd->bthd", p_attn, vh).reshape(B, T, C)
    attn_out = ctx @ p["wo"] + p["bo"]
    x1 = x + attn_out
    mean = x1.mean(-1, keepdims=True)
    var = ((x1 - mean) ** 2).mean(-1, keepdims=True)
    xn = (x1 - mean) / jnp.sqrt(var + LN_EPS) * p["g1"] + p["be1"]
    h1 = jnp.maximum(xn @ p["w1"] + p["b1"], 0.0)
    ff = h1 @ p["w2"] + p["b2"]
    x2 = xn + ff
    mean2 = x2.mean(-1, keepdims=True)
    var2 = ((x2 - mean2) ** 2).mean(-1, keepdims=True)
    y = (x2 - mean2) / jnp.sqrt(var2 + LN_EPS) * p["g2"] + p["be2"]
    return jnp.transpose(y, (1, 0, 2))


if __name__ == "__main__":
    key = jax.random.PRNGKey(0)
    kx, kp = jax.random.split(key)
    x = jax.random.normal(kx, (T, B, C), jnp.float32)     # (T, B, C) seq-first
    params = init_params(kp)

    y = transformer_encoder_layer(x, params)
    y = jax.block_until_ready(y)

    y_ref = reference(x, params)
    assert y.shape == (T, B, C)
    # bf16 MXU operands + approx reciprocal -> relaxed (but still tight)
    # tolerance against the pure-f32 reference.
    err = float(jnp.max(jnp.abs(y - y_ref)))
    assert err < 2e-2, f"kernel mismatch vs reference: {err}"

    print("KERNEL_OK")
</pallas_src>

<mosaic_0001>
module attributes {stable_mosaic.version = 11 : i64} {
  func.func @encoder_layer_kernel(%arg0: i32, %arg1: memref<32x32xf32, #tpu.memory_space<vmem>>, %arg2: memref<32x96xbf16, #tpu.memory_space<vmem>>, %arg3: memref<32x32xbf16, #tpu.memory_space<vmem>>, %arg4: memref<32x64xbf16, #tpu.memory_space<vmem>>, %arg5: memref<64x32xbf16, #tpu.memory_space<vmem>>, %arg6: memref<8x128xf32, #tpu.memory_space<vmem>>, %arg7: memref<32x32xf32, #tpu.memory_space<vmem>>, %arg8: memref<3x8x16x8xf32, #tpu.memory_space<vmem>>, %arg9: memref<32x32xf32, #tpu.memory_space<vmem>>) attributes {dimension_semantics = [#tpu.dimension_semantics<arbitrary>], iteration_bounds = array<i64: 1>, scalar_prefetch = 0 : i64, scratch_operands = 2 : i64, tpu.core_type = #tpu.core_type<tc>, window_params = [{pipeline_mode = #tpu.pipeline_mode<synchronous>, transform_indices = @transform_0, window_bounds = array<i64: 32, 32>}, {pipeline_mode = #tpu.pipeline_mode<synchronous>, transform_indices = @transform_1, window_bounds = array<i64: 32, 96>}, {pipeline_mode = #tpu.pipeline_mode<synchronous>, transform_indices = @transform_2, window_bounds = array<i64: 32, 32>}, {pipeline_mode = #tpu.pipeline_mode<synchronous>, transform_indices = @transform_3, window_bounds = array<i64: 32, 64>}, {pipeline_mode = #tpu.pipeline_mode<synchronous>, transform_indices = @transform_4, window_bounds = array<i64: 64, 32>}, {pipeline_mode = #tpu.pipeline_mode<synchronous>, transform_indices = @transform_5, window_bounds = array<i64: 8, 128>}, {pipeline_mode = #tpu.pipeline_mode<synchronous>, transform_indices = @transform_6, window_bounds = array<i64: 32, 32>}]} {
    %c0 = arith.constant 0 : index
    %c0_0 = arith.constant 0 : index
    %0 = vector.load %arg1[%c0, %c0_0] : memref<32x32xf32, #tpu.memory_space<vmem>>, vector<32x32xf32>
    %1 = arith.truncf %0 : vector<32x32xf32> to vector<32x32xbf16>
    %c0_1 = arith.constant 0 : index
    %c0_2 = arith.constant 0 : index
    %2 = vector.load %arg6[%c0_1, %c0_2] : memref<8x128xf32, #tpu.memory_space<vmem>>, vector<8x128xf32>
    %3 = vector.extract_strided_slice %2 {offsets = [0, 0], sizes = [1, 96], strides = [1, 1]} : vector<8x128xf32> to vector<1x96xf32>
    %4 = vector.extract_strided_slice %2 {offsets = [1, 0], sizes = [1, 64], strides = [1, 1]} : vector<8x128xf32> to vector<1x64xf32>
    %5 = vector.extract_strided_slice %2 {offsets = [2, 0], sizes = [1, 32], strides = [1, 1]} : vector<8x128xf32> to vector<1x32xf32>
    %6 = vector.extract_strided_slice %2 {offsets = [3, 0], sizes = [1, 32], strides = [1, 1]} : vector<8x128xf32> to vector<1x32xf32>
    %7 = vector.extract_strided_slice %2 {offsets = [4, 0], sizes = [1, 32], strides = [1, 1]} : vector<8x128xf32> to vector<1x32xf32>
    %8 = vector.extract_strided_slice %2 {offsets = [5, 0], sizes = [1, 32], strides = [1, 1]} : vector<8x128xf32> to vector<1x32xf32>
    %9 = vector.extract_strided_slice %2 {offsets = [6, 0], sizes = [1, 32], strides = [1, 1]} : vector<8x128xf32> to vector<1x32xf32>
    %10 = vector.extract_strided_slice %2 {offsets = [7, 0], sizes = [1, 32], strides = [1, 1]} : vector<8x128xf32> to vector<1x32xf32>
    %c0_3 = arith.constant 0 : index
    %c0_4 = arith.constant 0 : index
    %11 = vector.load %arg2[%c0_3, %c0_4] : memref<32x96xbf16, #tpu.memory_space<vmem>>, vector<32x96xbf16>
    %cst = arith.constant dense<0.000000e+00> : vector<32x96xf32>
    %12 = tpu.matmul %1, %11, %cst {dimension_numbers = #tpu.dot_dimension_numbers<[1], [0], [0], [1], [0, 0, 1, 1], [], []>} : vector<32x32xbf16>, vector<32x96xbf16>, vector<32x96xf32> -> vector<32x96xf32>
    %13 = vector.broadcast %3 : vector<1x96xf32> to vector<32x96xf32>
    %14 = arith.addf %12, %13 : vector<32x96xf32>
    %15 = vector.extract_strided_slice %14 {offsets = [0, 0], sizes = [32, 8], strides = [1, 1]} : vector<32x96xf32> to vector<32x8xf32>
    %16 = vector.shape_cast %15 : vector<32x8xf32> to vector<2x16x8xf32>
    %c0_5 = arith.constant 0 : index
    %c0_6 = arith.constant 0 : index
    %c0_7 = arith.constant 0 : index
    %c0_8 = arith.constant 0 : index
    %17 = vector.load %arg8[%c0_5, %c0_6, %c0_7, %c0_8] : memref<3x8x16x8xf32, #tpu.memory_space<vmem>>, vector<1x2x16x8xf32>
    %18 = vector.shape_cast %17 : vector<1x2x16x8xf32> to vector<2x16x8xf32>
    %19 = vector.shape_cast %16 : vector<2x16x8xf32> to vector<1x2x16x8xf32>
    tpu.vector_store %arg8[%c0_5, %c0_6, %c0_7, %c0_8], %19 {strides = array<i32>} : memref<3x8x16x8xf32, #tpu.memory_space<vmem>>, vector<1x2x16x8xf32>,
    %20 = vector.extract_strided_slice %14 {offsets = [0, 8], sizes = [32, 8], strides = [1, 1]} : vector<32x96xf32> to vector<32x8xf32>
    %21 = vector.shape_cast %20 : vector<32x8xf32> to vector<2x16x8xf32>
    %c0_9 = arith.constant 0 : index
    %c2 = arith.constant 2 : index
    %c0_10 = arith.constant 0 : index
    %c0_11 = arith.constant 0 : index
    %22 = vector.load %arg8[%c0_9, %c2, %c0_10, %c0_11] : memref<3x8x16x8xf32, #tpu.memory_space<vmem>>, vector<1x2x16x8xf32>
    %23 = vector.shape_cast %22 : vector<1x2x16x8xf32> to vector<2x16x8xf32>
    %24 = vector.shape_cast %21 : vector<2x16x8xf32> to vector<1x2x16x8xf32>
    tpu.vector_store %arg8[%c0_9, %c2, %c0_10, %c0_11], %24 {strides = array<i32>} : memref<3x8x16x8xf32, #tpu.memory_space<vmem>>, vector<1x2x16x8xf32>,
    %25 = vector.extract_strided_slice %14 {offsets = [0, 16], sizes = [32, 8], strides = [1, 1]} : vector<32x96xf32> to vector<32x8xf32>
    %26 = vector.shape_cast %25 : vector<32x8xf32> to vector<2x16x8xf32>
    %c0_12 = arith.constant 0 : index
    %c4 = arith.constant 4 : index
    %c0_13 = arith.constant 0 : index
    %c0_14 = arith.constant 0 : index
    %27 = vector.load %arg8[%c0_12, %c4, %c0_13, %c0_14] : memref<3x8x16x8xf32, #tpu.memory_space<vmem>>, vector<1x2x16x8xf32>
    %28 = vector.shape_cast %27 : vector<1x2x16x8xf32> to vector<2x16x8xf32>
    %29 = vector.shape_cast %26 : vector<2x16x8xf32> to vector<1x2x16x8xf32>
    tpu.vector_store %arg8[%c0_12, %c4, %c0_13, %c0_14], %29 {strides = array<i32>} : memref<3x8x16x8xf32, #tpu.memory_space<vmem>>, vector<1x2x16x8xf32>,
    %30 = vector.extract_strided_slice %14 {offsets = [0, 24], sizes = [32, 8], strides = [1, 1]} : vector<32x96xf32> to vector<32x8xf32>
    %31 = vector.shape_cast %30 : vector<32x8xf32> to vector<2x16x8xf32>
    %c0_15 = arith.constant 0 : index
    %c6 = arith.constant 6 : index
    %c0_16 = arith.constant 0 : index
    %c0_17 = arith.constant 0 : index
    %32 = vector.load %arg8[%c0_15, %c6, %c0_16, %c0_17] : memref<3x8x16x8xf32, #tpu.memory_space<vmem>>, vector<1x2x16x8xf32>
    %33 = vector.shape_cast %32 : vector<1x2x16x8xf32> to vector<2x16x8xf32>
    %34 = vector.shape_cast %31 : vector<2x16x8xf32> to vector<1x2x16x8xf32>
    tpu.vector_store %arg8[%c0_15, %c6, %c0_16, %c0_17], %34 {strides = array<i32>} : memref<3x8x16x8xf32, #tpu.memory_space<vmem>>, vector<1x2x16x8xf32>,
    %35 = vector.extract_strided_slice %14 {offsets = [0, 32], sizes = [32, 8], strides = [1, 1]} : vector<32x96xf32> to vector<32x8xf32>
    %36 = vector.shape_cast %35 : vector<32x8xf32> to vector<2x16x8xf32>
    %c1 = arith.constant 1 : index
    %c0_18 = arith.constant 0 : index
    %c0_19 = arith.constant 0 : index
    %c0_20 = arith.constant 0 : index
    %37 = vector.load %arg8[%c1, %c0_18, %c0_19, %c0_20] : memref<3x8x16x8xf32, #tpu.memory_space<vmem>>, vector<1x2x16x8xf32>
    %38 = vector.shape_cast %37 : vector<1x2x16x8xf32> to vector<2x16x8xf32>
    %39 = vector.shape_cast %36 : vector<2x16x8xf32> to vector<1x2x16x8xf32>
    tpu.vector_store %arg8[%c1, %c0_18, %c0_19, %c0_20], %39 {strides = array<i32>} : memref<3x8x16x8xf32, #tpu.memory_space<vmem>>, vector<1x2x16x8xf32>,
    %40 = vector.extract_strided_slice %14 {offsets = [0, 40], sizes = [32, 8], strides = [1, 1]} : vector<32x96xf32> to vector<32x8xf32>
    %41 = vector.shape_cast %40 : vector<32x8xf32> to vector<2x16x8xf32>
    %c1_21 = arith.constant 1 : index
    %c2_22 = arith.constant 2 : index
    %c0_23 = arith.constant 0 : index
    %c0_24 = arith.constant 0 : index
    %42 = vector.load %arg8[%c1_21, %c2_22, %c0_23, %c0_24] : memref<3x8x16x8xf32, #tpu.memory_space<vmem>>, vector<1x2x16x8xf32>
    %43 = vector.shape_cast %42 : vector<1x2x16x8xf32> to vector<2x16x8xf32>
    %44 = vector.shape_cast %41 : vector<2x16x8xf32> to vector<1x2x16x8xf32>
    tpu.vector_store %arg8[%c1_21, %c2_22, %c0_23, %c0_24], %44 {strides = array<i32>} : memref<3x8x16x8xf32, #tpu.memory_space<vmem>>, vector<1x2x16x8xf32>,
    %45 = vector.extract_strided_slice %14 {offsets = [0, 48], sizes = [32, 8], strides = [1, 1]} : vector<32x96xf32> to vector<32x8xf32>
    %46 = vector.shape_cast %45 : vector<32x8xf32> to vector<2x16x8xf32>
    %c1_25 = arith.constant 1 : index
    %c4_26 = arith.constant 4 : index
    %c0_27 = arith.constant 0 : index
    %c0_28 = arith.constant 0 : index
    %47 = vector.load %arg8[%c1_25, %c4_26, %c0_27, %c0_28] : memref<3x8x16x8xf32, #tpu.memory_space<vmem>>, vector<1x2x16x8xf32>
    %48 = vector.shape_cast %47 : vector<1x2x16x8xf32> to vector<2x16x8xf32>
    %49 = vector.shape_cast %46 : vector<2x16x8xf32> to vector<1x2x16x8xf32>
    tpu.vector_store %arg8[%c1_25, %c4_26, %c0_27, %c0_28], %49 {strides = array<i32>} : memref<3x8x16x8xf32, #tpu.memory_space<vmem>>, vector<1x2x16x8xf32>,
    %50 = vector.extract_strided_slice %14 {offsets = [0, 56], sizes = [32, 8], strides = [1, 1]} : vector<32x96xf32> to vector<32x8xf32>
    %51 = vector.shape_cast %50 : vector<32x8xf32> to vector<2x16x8xf32>
    %c1_29 = arith.constant 1 : index
    %c6_30 = arith.constant 6 : index
    %c0_31 = arith.constant 0 : index
    %c0_32 = arith.constant 0 : index
    %52 = vector.load %arg8[%c1_29, %c6_30, %c0_31, %c0_32] : memref<3x8x16x8xf32, #tpu.memory_space<vmem>>, vector<1x2x16x8xf32>
    %53 = vector.shape_cast %52 : vector<1x2x16x8xf32> to vector<2x16x8xf32>
    %54 = vector.shape_cast %51 : vector<2x16x8xf32> to vector<1x2x16x8xf32>
    tpu.vector_store %arg8[%c1_29, %c6_30, %c0_31, %c0_32], %54 {strides = array<i32>} : memref<3x8x16x8xf32, #tpu.memory_space<vmem>>, vector<1x2x16x8xf32>,
    %55 = vector.extract_strided_slice %14 {offsets = [0, 64], sizes = [32, 8], strides = [1, 1]} : vector<32x96xf32> to vector<32x8xf32>
    %56 = vector.shape_cast %55 : vector<32x8xf32> to vector<2x16x8xf32>
    %c2_33 = arith.constant 2 : index
    %c0_34 = arith.constant 0 : index
    %c0_35 = arith.constant 0 : index
    %c0_36 = arith.constant 0 : index
    %57 = vector.load %arg8[%c2_33, %c0_34, %c0_35, %c0_36] : memref<3x8x16x8xf32, #tpu.memory_space<vmem>>, vector<1x2x16x8xf32>
    %58 = vector.shape_cast %57 : vector<1x2x16x8xf32> to vector<2x16x8xf32>
    %59 = vector.shape_cast %56 : vector<2x16x8xf32> to vector<1x2x16x8xf32>
    tpu.vector_store %arg8[%c2_33, %c0_34, %c0_35, %c0_36], %59 {strides = array<i32>} : memref<3x8x16x8xf32, #tpu.memory_space<vmem>>, vector<1x2x16x8xf32>,
    %60 = vector.extract_strided_slice %14 {offsets = [0, 72], sizes = [32, 8], strides = [1, 1]} : vector<32x96xf32> to vector<32x8xf32>
    %61 = vector.shape_cast %60 : vector<32x8xf32> to vector<2x16x8xf32>
    %c2_37 = arith.constant 2 : index
    %c2_38 = arith.constant 2 : index
    %c0_39 = arith.constant 0 : index
    %c0_40 = arith.constant 0 : index
    %62 = vector.load %arg8[%c2_37, %c2_38, %c0_39, %c0_40] : memref<3x8x16x8xf32, #tpu.memory_space<vmem>>, vector<1x2x16x8xf32>
    %63 = vector.shape_cast %62 : vector<1x2x16x8xf32> to vector<2x16x8xf32>
    %64 = vector.shape_cast %61 : vector<2x16x8xf32> to vector<1x2x16x8xf32>
    tpu.vector_store %arg8[%c2_37, %c2_38, %c0_39, %c0_40], %64 {strides = array<i32>} : memref<3x8x16x8xf32, #tpu.memory_space<vmem>>, vector<1x2x16x8xf32>,
    %65 = vector.extract_strided_slice %14 {offsets = [0, 80], sizes = [32, 8], strides = [1, 1]} : vector<32x96xf32> to vector<32x8xf32>
    %66 = vector.shape_cast %65 : vector<32x8xf32> to vector<2x16x8xf32>
    %c2_41 = arith.constant 2 : index
    %c4_42 = arith.constant 4 : index
    %c0_43 = arith.constant 0 : index
    %c0_44 = arith.constant 0 : index
    %67 = vector.load %arg8[%c2_41, %c4_42, %c0_43, %c0_44] : memref<3x8x16x8xf32, #tpu.memory_space<vmem>>, vector<1x2x16x8xf32>
    %68 = vector.shape_cast %67 : vector<1x2x16x8xf32> to vector<2x16x8xf32>
    %69 = vector.shape_cast %66 : vector<2x16x8xf32> to vector<1x2x16x8xf32>
    tpu.vector_store %arg8[%c2_41, %c4_42, %c0_43, %c0_44], %69 {strides = array<i32>} : memref<3x8x16x8xf32, #tpu.memory_space<vmem>>, vector<1x2x16x8xf32>,
    %70 = vector.extract_strided_slice %14 {offsets = [0, 88], sizes = [32, 8], strides = [1, 1]} : vector<32x96xf32> to vector<32x8xf32>
    %71 = vector.shape_cast %70 : vector<32x8xf32> to vector<2x16x8xf32>
    %c2_45 = arith.constant 2 : index
    %c6_46 = arith.constant 6 : index
    %c0_47 = arith.constant 0 : index
    %c0_48 = arith.constant 0 : index
    %72 = vector.load %arg8[%c2_45, %c6_46, %c0_47, %c0_48] : memref<3x8x16x8xf32, #tpu.memory_space<vmem>>, vector<1x2x16x8xf32>
    %73 = vector.shape_cast %72 : vector<1x2x16x8xf32> to vector<2x16x8xf32>
    %74 = vector.shape_cast %71 : vector<2x16x8xf32> to vector<1x2x16x8xf32>
    tpu.vector_store %arg8[%c2_45, %c6_46, %c0_47, %c0_48], %74 {strides = array<i32>} : memref<3x8x16x8xf32, #tpu.memory_space<vmem>>, vector<1x2x16x8xf32>,
    %c0_49 = arith.constant 0 : index
    %c0_50 = arith.constant 0 : index
    %c0_51 = arith.constant 0 : index
    %c0_52 = arith.constant 0 : index
    %75 = vector.load %arg8[%c0_49, %c0_50, %c0_51, %c0_52] : memref<3x8x16x8xf32, #tpu.memory_space<vmem>>, vector<1x8x16x8xf32>
    %76 = vector.shape_cast %75 : vector<1x8x16x8xf32> to vector<8x16x8xf32>
    %77 = arith.truncf %76 : vector<8x16x8xf32> to vector<8x16x8xbf16>
    %c1_53 = arith.constant 1 : index
    %c0_54 = arith.constant 0 : index
    %c0_55 = arith.constant 0 : index
    %c0_56 = arith.constant 0 : index
    %78 = vector.load %arg8[%c1_53, %c0_54, %c0_55, %c0_56] : memref<3x8x16x8xf32, #tpu.memory_space<vmem>>, vector<1x8x16x8xf32>
    %79 = vector.shape_cast %78 : vector<1x8x16x8xf32> to vector<8x16x8xf32>
    %80 = arith.truncf %79 : vector<8x16x8xf32> to vector<8x16x8xbf16>
    %c2_57 = arith.constant 2 : index
    %c0_58 = arith.constant 0 : index
    %c0_59 = arith.constant 0 : index
    %c0_60 = arith.constant 0 : index
    %81 = vector.load %arg8[%c2_57, %c0_58, %c0_59, %c0_60] : memref<3x8x16x8xf32, #tpu.memory_space<vmem>>, vector<1x8x16x8xf32>
    %82 = vector.shape_cast %81 : vector<1x8x16x8xf32> to vector<8x16x8xf32>
    %83 = arith.truncf %82 : vector<8x16x8xf32> to vector<8x16x8xbf16>
    "tpu.trace_start"() <{level = 10 : i32, message = "btd,bsd->bts"}> : () -> ()
    %cst_61 = arith.constant dense<0.000000e+00> : vector<8x16x16xf32>
    %84 = tpu.matmul %77, %80, %cst_61 {dimension_numbers = #tpu.dot_dimension_numbers<[2], [2], [1], [1], [0, 0, 0, 1, 1, 1], [0], [0]>} : vector<8x16x8xbf16>, vector<8x16x8xbf16>, vector<8x16x16xf32> -> vector<8x16x16xf32>
    "tpu.trace_stop"() : () -> ()
    %cst_62 = arith.constant dense<0xFF800000> : vector<8x16xf32>
    %85 = vector.multi_reduction <maximumf>, %84, %cst_62 [2] : vector<8x16x16xf32> to vector<8x16xf32>
    %86 = vector.shape_cast %85 : vector<8x16xf32> to vector<8x16x1xf32>
    %87 = vector.broadcast %86 : vector<8x16x1xf32> to vector<8x16x16xf32>
    %88 = arith.subf %84, %87 : vector<8x16x16xf32>
    %89 = math.exp %88 : vector<8x16x16xf32>
    %cst_63 = arith.constant dense<0.000000e+00> : vector<8x16xf32>
    %90 = vector.multi_reduction <add>, %89, %cst_63 [2] : vector<8x16x16xf32> to vector<8x16xf32>
    %91 = vector.shape_cast %90 : vector<8x16xf32> to vector<8x16x1xf32>
    %92 = tpu.reciprocal %91 {approx = true} : vector<8x16x1xf32> -> vector<8x16x1xf32>
    %93 = vector.broadcast %92 : vector<8x16x1xf32> to vector<8x16x16xf32>
    %94 = arith.mulf %89, %93 : vector<8x16x16xf32>
    %95 = arith.truncf %94 : vector<8x16x16xf32> to vector<8x16x16xbf16>
    "tpu.trace_start"() <{level = 10 : i32, message = "bts,bsd->btd"}> : () -> ()
    %cst_64 = arith.constant dense<0.000000e+00> : vector<8x16x8xf32>
    %96 = tpu.matmul %95, %83, %cst_64 {dimension_numbers = #tpu.dot_dimension_numbers<[2], [1], [1], [2], [0, 0, 0, 1, 1, 2], [0], [0]>} : vector<8x16x16xbf16>, vector<8x16x8xbf16>, vector<8x16x8xf32> -> vector<8x16x8xf32>
    "tpu.trace_stop"() : () -> ()
    %97 = vector.extract_strided_slice %96 {offsets = [0, 0, 0], sizes = [2, 16, 8], strides = [1, 1, 1]} : vector<8x16x8xf32> to vector<2x16x8xf32>
    %98 = vector.shape_cast %97 : vector<2x16x8xf32> to vector<32x8xf32>
    %c0_65 = arith.constant 0 : index
    %c0_66 = arith.constant 0 : index
    %99 = vector.load %arg9[%c0_65, %c0_66] : memref<32x32xf32, #tpu.memory_space<vmem>>, vector<32x8xf32>
    tpu.vector_store %arg9[%c0_65, %c0_66], %98 {strides = array<i32>} : memref<32x32xf32, #tpu.memory_space<vmem>>, vector<32x8xf32>,
    %100 = vector.extract_strided_slice %96 {offsets = [2, 0, 0], sizes = [2, 16, 8], strides = [1, 1, 1]} : vector<8x16x8xf32> to vector<2x16x8xf32>
    %101 = vector.shape_cast %100 : vector<2x16x8xf32> to vector<32x8xf32>
    %c0_67 = arith.constant 0 : index
    %c8 = arith.constant 8 : index
    %102 = vector.load %arg9[%c0_67, %c8] : memref<32x32xf32, #tpu.memory_space<vmem>>, vector<32x8xf32>
    tpu.vector_store %arg9[%c0_67, %c8], %101 {strides = array<i32>} : memref<32x32xf32, #tpu.memory_space<vmem>>, vector<32x8xf32>,
    %103 = vector.extract_strided_slice %96 {offsets = [4, 0, 0], sizes = [2, 16, 8], strides = [1, 1, 1]} : vector<8x16x8xf32> to vector<2x16x8xf32>
    %104 = vector.shape_cast %103 : vector<2x16x8xf32> to vector<32x8xf32>
    %c0_68 = arith.constant 0 : index
    %c16 = arith.constant 16 : index
    %105 = vector.load %arg9[%c0_68, %c16] : memref<32x32xf32, #tpu.memory_space<vmem>>, vector<32x8xf32>
    tpu.vector_store %arg9[%c0_68, %c16], %104 {strides = array<i32>} : memref<32x32xf32, #tpu.memory_space<vmem>>, vector<32x8xf32>,
    %106 = vector.extract_strided_slice %96 {offsets = [6, 0, 0], sizes = [2, 16, 8], strides = [1, 1, 1]} : vector<8x16x8xf32> to vector<2x16x8xf32>
    %107 = vector.shape_cast %106 : vector<2x16x8xf32> to vector<32x8xf32>
    %c0_69 = arith.constant 0 : index
    %c24 = arith.constant 24 : index
    %108 = vector.load %arg9[%c0_69, %c24] : memref<32x32xf32, #tpu.memory_space<vmem>>, vector<32x8xf32>
    tpu.vector_store %arg9[%c0_69, %c24], %107 {strides = array<i32>} : memref<32x32xf32, #tpu.memory_space<vmem>>, vector<32x8xf32>,
    %c0_70 = arith.constant 0 : index
    %c0_71 = arith.constant 0 : index
    %109 = vector.load %arg9[%c0_70, %c0_71] : memref<32x32xf32, #tpu.memory_space<vmem>>, vector<32x32xf32>
    %110 = arith.truncf %109 : vector<32x32xf32> to vector<32x32xbf16>
    %c0_72 = arith.constant 0 : index
    %c0_73 = arith.constant 0 : index
    %111 = vector.load %arg3[%c0_72, %c0_73] : memref<32x32xbf16, #tpu.memory_space<vmem>>, vector<32x32xbf16>
    %cst_74 = arith.constant dense<0.000000e+00> : vector<32x32xf32>
    %112 = tpu.matmul %110, %111, %cst_74 {dimension_numbers = #tpu.dot_dimension_numbers<[1], [0], [0], [1], [0, 0, 1, 1], [], []>} : vector<32x32xbf16>, vector<32x32xbf16>, vector<32x32xf32> -> vector<32x32xf32>
    %113 = vector.broadcast %5 : vector<1x32xf32> to vector<32x32xf32>
    %114 = arith.addf %112, %113 : vector<32x32xf32>
    %115 = arith.addf %0, %114 : vector<32x32xf32>
    %cst_75 = arith.constant dense<0.000000e+00> : vector<32xf32>
    %116 = vector.multi_reduction <add>, %115, %cst_75 [1] : vector<32x32xf32> to vector<32xf32>
    %117 = vector.shape_cast %116 : vector<32xf32> to vector<32x1xf32>
    %cst_76 = arith.constant 3.200000e+01 : f32
    %118 = vector.broadcast %cst_76 : f32 to vector<32x1xf32>
    %119 = arith.divf %117, %118 : vector<32x1xf32>
    %120 = vector.broadcast %119 : vector<32x1xf32> to vector<32x32xf32>
    %121 = arith.subf %115, %120 : vector<32x32xf32>
    %122 = arith.mulf %121, %121 : vector<32x32xf32>
    %cst_77 = arith.constant dense<0.000000e+00> : vector<32xf32>
    %123 = vector.multi_reduction <add>, %122, %cst_77 [1] : vector<32x32xf32> to vector<32xf32>
    %124 = vector.shape_cast %123 : vector<32xf32> to vector<32x1xf32>
    %cst_78 = arith.constant 3.200000e+01 : f32
    %125 = vector.broadcast %cst_78 : f32 to vector<32x1xf32>
    %126 = arith.divf %124, %125 : vector<32x1xf32>
    %127 = vector.broadcast %119 : vector<32x1xf32> to vector<32x32xf32>
    %128 = arith.subf %115, %127 : vector<32x32xf32>
    %cst_79 = arith.constant 9.99999974E-6 : f32
    %129 = vector.broadcast %cst_79 : f32 to vector<32x1xf32>
    %130 = arith.addf %126, %129 : vector<32x1xf32>
    %131 = math.rsqrt %130 : vector<32x1xf32>
    %132 = vector.broadcast %131 : vector<32x1xf32> to vector<32x32xf32>
    %133 = arith.mulf %128, %132 : vector<32x32xf32>
    %134 = vector.broadcast %6 : vector<1x32xf32> to vector<32x32xf32>
    %135 = arith.mulf %133, %134 : vector<32x32xf32>
    %136 = vector.broadcast %7 : vector<1x32xf32> to vector<32x32xf32>
    %137 = arith.addf %135, %136 : vector<32x32xf32>
    %138 = arith.truncf %137 : vector<32x32xf32> to vector<32x32xbf16>
    %c0_80 = arith.constant 0 : index
    %c0_81 = arith.constant 0 : index
    %139 = vector.load %arg4[%c0_80, %c0_81] : memref<32x64xbf16, #tpu.memory_space<vmem>>, vector<32x64xbf16>
    %cst_82 = arith.constant dense<0.000000e+00> : vector<32x64xf32>
    %140 = tpu.matmul %138, %139, %cst_82 {dimension_numbers = #tpu.dot_dimension_numbers<[1], [0], [0], [1], [0, 0, 1, 1], [], []>} : vector<32x32xbf16>, vector<32x64xbf16>, vector<32x64xf32> -> vector<32x64xf32>
    %141 = vector.broadcast %4 : vector<1x64xf32> to vector<32x64xf32>
    %142 = arith.addf %140, %141 : vector<32x64xf32>
    %cst_83 = arith.constant 0.000000e+00 : f32
    %143 = vector.broadcast %cst_83 : f32 to vector<32x64xf32>
    %144 = arith.maximumf %142, %143 : vector<32x64xf32>
    %145 = arith.truncf %144 : vector<32x64xf32> to vector<32x64xbf16>
    %c0_84 = arith.constant 0 : index
    %c0_85 = arith.constant 0 : index
    %146 = vector.load %arg5[%c0_84, %c0_85] : memref<64x32xbf16, #tpu.memory_space<vmem>>, vector<64x32xbf16>
    %cst_86 = arith.constant dense<0.000000e+00> : vector<32x32xf32>
    %147 = tpu.matmul %145, %146, %cst_86 {dimension_numbers = #tpu.dot_dimension_numbers<[1], [0], [0], [1], [0, 0, 1, 1], [], []>} : vector<32x64xbf16>, vector<64x32xbf16>, vector<32x32xf32> -> vector<32x32xf32>
    %148 = vector.broadcast %8 : vector<1x32xf32> to vector<32x32xf32>
    %149 = arith.addf %147, %148 : vector<32x32xf32>
    %150 = arith.addf %137, %149 : vector<32x32xf32>
    %cst_87 = arith.constant dense<0.000000e+00> : vector<32xf32>
    %151 = vector.multi_reduction <add>, %150, %cst_87 [1] : vector<32x32xf32> to vector<32xf32>
    %152 = vector.shape_cast %151 : vector<32xf32> to vector<32x1xf32>
    %cst_88 = arith.constant 3.200000e+01 : f32
    %153 = vector.broadcast %cst_88 : f32 to vector<32x1xf32>
    %154 = arith.divf %152, %153 : vector<32x1xf32>
    %155 = vector.broadcast %154 : vector<32x1xf32> to vector<32x32xf32>
    %156 = arith.subf %150, %155 : vector<32x32xf32>
    %157 = arith.mulf %156, %156 : vector<32x32xf32>
    %cst_89 = arith.constant dense<0.000000e+00> : vector<32xf32>
    %158 = vector.multi_reduction <add>, %157, %cst_89 [1] : vector<32x32xf32> to vector<32xf32>
    %159 = vector.shape_cast %158 : vector<32xf32> to vector<32x1xf32>
    %cst_90 = arith.constant 3.200000e+01 : f32
    %160 = vector.broadcast %cst_90 : f32 to vector<32x1xf32>
    %161 = arith.divf %159, %160 : vector<32x1xf32>
    %162 = vector.broadcast %154 : vector<32x1xf32> to vector<32x32xf32>
    %163 = arith.subf %150, %162 : vector<32x32xf32>
    %cst_91 = arith.constant 9.99999974E-6 : f32
    %164 = vector.broadcast %cst_91 : f32 to vector<32x1xf32>
    %165 = arith.addf %161, %164 : vector<32x1xf32>
    %166 = math.rsqrt %165 : vector<32x1xf32>
    %167 = vector.broadcast %166 : vector<32x1xf32> to vector<32x32xf32>
    %168 = arith.mulf %163, %167 : vector<32x32xf32>
    %169 = vector.broadcast %9 : vector<1x32xf32> to vector<32x32xf32>
    %170 = arith.mulf %168, %169 : vector<32x32xf32>
    %171 = vector.broadcast %10 : vector<1x32xf32> to vector<32x32xf32>
    %172 = arith.addf %170, %171 : vector<32x32xf32>
    %c0_92 = arith.constant 0 : index
    %c0_93 = arith.constant 0 : index
    %173 = vector.load %arg7[%c0_92, %c0_93] : memref<32x32xf32, #tpu.memory_space<vmem>>, vector<32x32xf32>
    tpu.vector_store %arg7[%c0_92, %c0_93], %172 {strides = array<i32>} : memref<32x32xf32, #tpu.memory_space<vmem>>, vector<32x32xf32>,
    return
  }
  func.func @transform_0(%arg0: i32) -> (i32, i32) {
    %c0_i32 = arith.constant 0 : i32
    %c0_i32_0 = arith.constant 0 : i32
    %c0_i32_1 = arith.constant 0 : i32
    return %c0_i32, %c0_i32_0 : i32, i32
  }
  func.func @transform_1(%arg0: i32) -> (i32, i32) {
    %c0_i32 = arith.constant 0 : i32
    %c0_i32_0 = arith.constant 0 : i32
    %c0_i32_1 = arith.constant 0 : i32
    return %c0_i32, %c0_i32_0 : i32, i32
  }
  func.func @transform_2(%arg0: i32) -> (i32, i32) {
    %c0_i32 = arith.constant 0 : i32
    %c0_i32_0 = arith.constant 0 : i32
    %c0_i32_1 = arith.constant 0 : i32
    return %c0_i32, %c0_i32_0 : i32, i32
  }
  func.func @transform_3(%arg0: i32) -> (i32, i32) {
    %c0_i32 = arith.constant 0 : i32
    %c0_i32_0 = arith.constant 0 : i32
    %c0_i32_1 = arith.constant 0 : i32
    return %c0_i32, %c0_i32_0 : i32, i32
  }
  func.func @transform_4(%arg0: i32) -> (i32, i32) {
    %c0_i32 = arith.constant 0 : i32
    %c0_i32_0 = arith.constant 0 : i32
    %c0_i32_1 = arith.constant 0 : i32
    return %c0_i32, %c0_i32_0 : i32, i32
  }
  func.func @transform_5(%arg0: i32) -> (i32, i32) {
    %c0_i32 = arith.constant 0 : i32
    %c0_i32_0 = arith.constant 0 : i32
    %c0_i32_1 = arith.constant 0 : i32
    return %c0_i32, %c0_i32_0 : i32, i32
  }
  func.func @transform_6(%arg0: i32) -> (i32, i32) {
    %c0_i32 = arith.constant 0 : i32
    %c0_i32_0 = arith.constant 0 : i32
    %c0_i32_1 = arith.constant 0 : i32
    return %c0_i32, %c0_i32_0 : i32, i32
  }
}

</mosaic_0001>

<bundles_post_ra>
// kernel: tpu_custom_call.1
= control target key start
LH: loop header
LB: loop body
LE: loop exit
PB: predicated region body
PF: predicated region fallthrough
CT: control target
= control target key end

     0   :  { %11 = vsyncpa [#allocation5], 0  ;;  %s2300_s0 = inlined_call_operand.vmem [shape: f32[32,32], index: 0, kind: input, shape index: {}]   ;;  %s2301_s1 = inlined_call_operand.vmem [shape: bf16[32,96], index: 1, kind: input, shape index: {}]   ;;  %s2302_s2 = inlined_call_operand.hbm [shape: bf16[32,32], index: 2, kind: input, shape index: {}]   ;;  %s2303_s3 = inlined_call_operand.hbm [shape: bf16[32,64], index: 3, kind: input, shape index: {}]   ;;  %s2304_s4 = inlined_call_operand.vmem [shape: bf16[64,32], index: 4, kind: input, shape index: {}]   ;;  %s2305_s5 = inlined_call_operand.hbm [shape: f32[8,128], index: 5, kind: input, shape index: {}]   ;;  %s2306_s6 = inlined_call_operand.hbm [shape: f32[32,32], index: 6, kind: output, shape index: {}]  }
   0x1   :  { %12 = vsyncpa [#allocation8], 0 }
   0x2   :  { %13 = vsyncpa [#allocation6], 0  ;;  %s35_s23 = sshll.u32 %s2303_s3, 4  ;;  %s1814_s24 = smov [#allocation7]   ;;  %s36_s23 = int_to_ptr.hbm [resolvable:$true] %s35_s23 }
   0x3   :  { %s37_s25 = sshll.u32 %s1814_s24, 4  ;;  %s22_s28 = sshll.u32 %s2302_s2, 4  ;;  %s38_s25 = int_to_ptr.vmem [resolvable:$true] %s37_s25  ;;  %s23_s28 = int_to_ptr.hbm [resolvable:$true] %s22_s28 }
   0x4   :  { %s1815_s29 = smov 64   ;;  %s1816_s30 = smov 4  }
   0x5   :  { %43 = dma.hbm_to_vmem [thread:$0]  %s36_s23, 256, %s38_s25, [#allocation8], %s1815_s29, %s1815_s29, %s1816_s30  }
   0x6   :  { %s1817_s7 = smov [#allocation4]   ;;  %s51_s3 = sshll.u32 %s2305_s5, 4  ;;  %s52_s3 = int_to_ptr.hbm [resolvable:$true] %s51_s3 }
   0x7   :  { %s24_s8 = sshll.u32 %s1817_s7, 4  ;;  %s1818_s11 = smov [#allocation9]   ;;  %s25_s8 = int_to_ptr.vmem [resolvable:$true] %s24_s8 }
   0x8   :  { %30 = dma.hbm_to_vmem [thread:$0]  %s23_s28, 256, %s25_s8, [#allocation5], %s1815_s29, %s1815_s29, %s1816_s30  }
   0x9   :  { %s53_s12 = sshll.u32 %s1818_s11, 4  ;;  %s54_s12 = int_to_ptr.vmem [resolvable:$true] %s53_s12 }
   0xa   :  { %56 = dma.hbm_to_vmem [thread:$0]  %s52_s3, 128, %s54_s12, [#allocation8]  }
   0xb   :  { %1808 = dma.done.wait [#allocation5], 256  }
   0xc   :  { %1809 = vsyncadd [#allocation5], 4294967040 }
   0xd   :  { %1810 = dma.done.wait [#allocation8], 384  }
   0xe   :  { %1811 = vsyncadd [#allocation8], 4294966912  ;;  %v1593_v0 = vld [vmem:[%s2301_s1 + $0x8] sm:$0xff]  ;;  %v1592_v1 = vld [vmem:[%s2301_s1] sm:$0xff]  ;;  %vm94_vm0 = vcmask 261120   ;;  %vm120_vm1 = vcmask 64512  }
   0xf   :  { %v70_v2 = vld [vmem:[%s2300_s0] sm:$0xff]  ;;  %107 = vmatpush.bf16.msra.mxu0 %v1593_v0  ;;  %1602 = vmatpush.bf16.msra.mxu1 %v1593_v0  ;;  %v71_v3 = vld [vmem:[%s2300_s0 + $0x8] sm:$0xff]  ;;  %v72_v4 = vld [vmem:[%s2300_s0 + $0x10] sm:$0xff]  ;;  %s1819_s1 = smov 96   ;;  %s1820_s23 = smov 88   ;;  %vm652_vm2 = vcmask 130048  }
  0x10   :  { %v73_v5 = vld [vmem:[%s2300_s0 + $0x18] sm:$0xff]  ;;  %v74_v6 = vpack.c.bf16 %v71_v3, %v70_v2  ;;  %v76_v8 = vld [vmem:[#allocation9] sm:$0xff]  ;;  %s1821_s24 = smov 120   ;;  %s1822_s25 = smov 80   ;;  %vm1089_vm3 = vcmask 130112   ;;  %vm1110_vm4 = vcmask 195712  }
  0x11   :  { %v75_v7 = vpack.c.bf16 %v73_v5, %v72_v4  ;;  %v81_v9 = vperm.slane %v76_v8, 0  ;;  %s1823_s26 = smov 112   ;;  %s1824_s27 = smov 72   ;;  %vm1131_vm5 = vcmask 261312  }
  0x12   :  { %s1825_s28 = smov 104   ;;  %s1826_s30 = smov 56  }
  0x13   :  { %108 = vmatpush.bf16.msra.mxu0 %v1592_v1  ;;  %1603 = vmatpush.bf16.msra.mxu1 %v1592_v1  ;;  %s1827_s7 = smov 40   ;;  %s1828_s8 = smov 48  }
  0x14   :  { %s1830_s9 = smov 16   ;;  %s1831_s10 = smov 24  }
  0x16   :  { %1536 = vmatmul.msk.bf16.vlgmr.msra.gmra.mxu0 %vm94_vm0, %v74_v6  ;;  %1537 = vmatmul.msk.bf16.vlgmr.msra.gmra.mxu1 %vm94_vm0, %v75_v7 }
  0x93   :  { %v110_v10 = vpop.f32.mrf.mxu0  ;;  %v115_v11 = vpop.f32.mrf.mxu1 }
  0x94   :  { %v111_v12 = vadd.f32 %v110_v10, %v81_v9  ;;  %v1903_v13 = vadd.f32 %v115_v11, %v81_v9 }
  0x96   :  { %184 = vrot.lane.b32.xlu0 %v1903_v13, %s1819_s1  ;;  %197 = vrot.lane.b32.xlu2 %v111_v12, %s1820_s23  ;;  %121 = vst.msk [vmem:[#allocation2] sm:$0xff] %vm120_vm1, %v111_v12 }
  0x97   :  { %180 = vrot.lane.b32.xlu1 %v111_v12, %s1819_s1  ;;  %123 = vst.msk [vmem:[#allocation2 + $0x10] sm:$0xff] %vm120_vm1, %v1903_v13 }
  0x9b   :  { %v112_v14 = vpop.f32.mrf.mxu0  ;;  %v117_v15 = vpop.f32.mrf.mxu1 }
  0x9c   :  { %v1910_v16 = vadd.f32 %v112_v14, %v81_v9  ;;  %v1912_v17 = vadd.f32 %v117_v15, %v81_v9 }
  0x9d   :  { %v316_v58 = vld [vmem:[#allocation2] sm:$0xff] }
  0x9e   :  { %129 = vrot.lane.b32.xlu0 %v111_v12, %s1821_s24  ;;  %214 = vrot.lane.b32.xlu2 %v111_v12, %s1822_s25  ;;  %122 = vst.msk [vmem:[#allocation2 + $0x8] sm:$0xff] %vm120_vm1, %v1910_v16  ;;  %v318_v53 = vld [vmem:[#allocation2 + $0x10] sm:$0xff]  ;;  %v332_v3 = vpack.c.bf16 %v316_v58, %v316_v58 }
  0x9f   :  { %146 = vrot.lane.b32.xlu1 %v111_v12, %s1823_s26  ;;  %124 = vst.msk [vmem:[#allocation2 + $0x18] sm:$0xff] %vm120_vm1, %v1912_v17  ;;  %v334_v62 = vpack.c.bf16 %v318_v53, %v318_v53 }
  0xa0   :  { %v414_v14 = vunpack.c.l.b16 %v332_v3 }
  0xa1   :  { %v444_v9 = vunpack.c.l.b16 %v334_v62 }
  0xa5   :  { %v317_v52 = vld [vmem:[#allocation2 + $0x8] sm:$0xff] }
  0xa6   :  { %186 = vrot.lane.b32.xlu0 %v1912_v17, %s1819_s1  ;;  %199 = vrot.lane.b32.xlu2 %v1910_v16, %s1820_s23  ;;  %v319_v48 = vld [vmem:[#allocation2 + $0x18] sm:$0xff]  ;;  %v333_v61 = vpack.c.bf16 %v317_v52, %v317_v52 }
  0xa7   :  { %182 = vrot.lane.b32.xlu1 %v1910_v16, %s1819_s1  ;;  %v335_v57 = vpack.c.bf16 %v319_v48, %v319_v48 }
  0xa8   :  { %v415_v8 = vunpack.c.l.b16 %v333_v61 }
  0xa9   :  { %v445_v4 = vunpack.c.l.b16 %v335_v57 }
  0xab   :  { %v446_v15 = vpack.c.b16 %v445_v4, %v444_v9 }
  0xae   :  { %201 = vrot.lane.b32.xlu0 %v1903_v13, %s1820_s23  ;;  %231 = vrot.lane.b32.xlu2 %v111_v12, %s1824_s27 }
  0xaf   :  { %218 = vrot.lane.b32.xlu1 %v1903_v13, %s1822_s25 }
  0xb6   :  { %216 = vrot.lane.b32.xlu0 %v1910_v16, %s1822_s25  ;;  %163 = vrot.lane.b32.xlu2 %v111_v12, %s1825_s28 }
  0xb7   :  { %131 = vrot.lane.b32.xlu1 %v1910_v16, %s1821_s24 }
  0xbe   :  { %133 = vrot.lane.b32.xlu0 %v1903_v13, %s1821_s24  ;;  %148 = vrot.lane.b32.xlu2 %v1910_v16, %s1823_s26 }
  0xbf   :  { %150 = vrot.lane.b32.xlu1 %v1903_v13, %s1823_s26 }
  0xc6   :  { %233 = vrot.lane.b32.xlu0 %v1910_v16, %s1824_s27  ;;  %220 = vrot.lane.b32.xlu2 %v1912_v17, %s1822_s25  ;;  %s1514_s25 = sshll.u32 %s2306_s6, 4  ;;  %s1515_s25 = int_to_ptr.hbm [resolvable:$true] %s1514_s25 }
  0xc7   :  { %203 = vrot.lane.b32.xlu1 %v1912_v17, %s1820_s23 }
  0xce   :  { %165 = vrot.lane.b32.xlu0 %v1910_v16, %s1825_s28  ;;  %152 = vrot.lane.b32.xlu2 %v1912_v17, %s1823_s26  ;;  %s1834_s26 = smov 128  }
  0xcf   :  { %135 = vrot.lane.b32.xlu1 %v1912_v17, %s1821_s24 }
  0xd6   :  { %235 = vrot.lane.b32.xlu0 %v1903_v13, %s1824_s27  ;;  %167 = vrot.lane.b32.xlu2 %v1903_v13, %s1825_s28 }
  0xd7   :  { %237 = vrot.lane.b32.xlu1 %v1912_v17, %s1824_s27 }
  0xde   :  { %169 = vrot.lane.b32.xlu0 %v1912_v17, %s1825_s28  ;;  %250 = vrot.lane.b32.xlu2 %v1910_v16, %s1815_s29 }
  0xdf   :  { %248 = vrot.lane.b32.xlu1 %v111_v12, %s1815_s29 }
  0xe6   :  { %265 = vrot.lane.b32.xlu0 %v111_v12, %s1826_s30  ;;  %271 = vrot.lane.b32.xlu2 %v1912_v17, %s1826_s30 }
  0xe7   :  { %269 = vrot.lane.b32.xlu1 %v1903_v13, %s1826_s30 }
  0xee   :  { %252 = vrot.lane.b32.xlu0 %v1903_v13, %s1815_s29 }
  0xef   :  { %299 = vrot.lane.b32.xlu1 %v111_v12, %s1827_s7 }
  0xf0   :  { %v198_v18 = vpop.permute.xlu2 %197 }
  0xf1   :  { %210 = vst.msk [vmem:[#allocation2 + $0xa0] sm:$0xff] %vm120_vm1, %v198_v18 }
  0xf6   :  { %282 = vrot.lane.b32.xlu0 %v111_v12, %s1828_s8 }
  0xf7   :  { %267 = vrot.lane.b32.xlu1 %v1910_v16, %s1826_s30 }
  0xf8   :  { %v215_v19 = vpop.permute.xlu2 %214  ;;  %v352_v21 = vld [vmem:[#allocation2 + $0xa0] sm:$0xff] }
  0xf9   :  { %227 = vst.msk [vmem:[#allocation2 + $0xc0] sm:$0xff] %vm120_vm1, %v215_v19  ;;  %v368_v22 = vpack.c.bf16 %v352_v21, %v352_v21 }
  0xfb   :  { %v479_v28 = vunpack.c.l.b16 %v368_v22 }
  0xfe   :  { %254 = vrot.lane.b32.xlu0 %v1912_v17, %s1815_s29  ;;  %s1829_s29 = smov 8  }
 0x100   :  { %v200_v20 = vpop.permute.xlu2 %199  ;;  %v356_v12 = vld [vmem:[#allocation2 + $0xc0] sm:$0xff] }
 0x101   :  { %211 = vst.msk [vmem:[#allocation2 + $0xa8] sm:$0xff] %vm120_vm1, %v200_v20  ;;  %v416_v20 = vpack.c.b16 %v415_v8, %v414_v14  ;;  %v372_v22 = vpack.c.bf16 %v356_v12, %v356_v12 }
 0x106   :  { %284 = vrot.lane.b32.xlu0 %v1910_v16, %s1828_s8 }
 0x108   :  { %v185_v23 = vpop.permute.xlu0 %184  ;;  %v232_v24 = vpop.permute.xlu2 %231  ;;  %v353_v25 = vld [vmem:[#allocation2 + $0xa8] sm:$0xff] }
 0x109   :  { %195 = vst.msk [vmem:[#allocation2 + $0x90] sm:$0xff] %vm120_vm1, %v185_v23  ;;  %v181_v26 = vpop.permute.xlu1 %180  ;;  %v369_v27 = vpack.c.bf16 %v353_v25, %v353_v25 }
 0x10a   :  { %244 = vst.msk [vmem:[#allocation2 + $0xe0] sm:$0xff] %vm120_vm1, %v232_v24 }
 0x10b   :  { %193 = vst.msk [vmem:[#allocation2 + $0x80] sm:$0xff] %vm120_vm1, %v181_v26  ;;  %v480_v29 = vunpack.c.l.b16 %v369_v27 }
 0x10d   :  { %v481_v30 = vpack.c.b16 %v480_v29, %v479_v28 }
 0x10f   :  { %v486_v31 = vsel %vm120_vm1, %v481_v30, 0 }
 0x110   :  { %v130_v32 = vpop.permute.xlu0 %129  ;;  %495 = vmatpush.bf16.xpose.msra.mxu3 %v486_v31  ;;  %v164_v33 = vpop.permute.xlu2 %163  ;;  %v350_v38 = vld [vmem:[#allocation2 + $0x90] sm:$0xff] }
 0x111   :  { %142 = vst.msk [vmem:[#allocation2 + $0x20] sm:$0xff] %vm120_vm1, %v130_v32  ;;  %v147_v34 = vpop.permute.xlu1 %146  ;;  %v366_v40 = vpack.c.bf16 %v350_v38, %v350_v38 }
 0x112   :  { %176 = vst.msk [vmem:[#allocation2 + $0x60] sm:$0xff] %vm120_vm1, %v164_v33  ;;  %v348_v39 = vld [vmem:[#allocation2 + $0x80] sm:$0xff]  ;;  %v539_v33 = vunpack.c.l.b16 %v372_v22 }
 0x113   :  { %159 = vst.msk [vmem:[#allocation2 + $0x40] sm:$0xff] %vm120_vm1, %v147_v34  ;;  %v364_v46 = vpack.c.bf16 %v348_v39, %v348_v39  ;;  %v449_v49 = vunpack.c.l.b16 %v366_v40 }
 0x115   :  { %v419_v55 = vunpack.c.l.b16 %v364_v46 }
 0x118   :  { %v187_v35 = vpop.permute.xlu0 %186  ;;  %v149_v36 = vpop.permute.xlu2 %148  ;;  %v320_v19 = vld [vmem:[#allocation2 + $0x20] sm:$0xff] }
 0x119   :  { %196 = vst.msk [vmem:[#allocation2 + $0x98] sm:$0xff] %vm120_vm1, %v187_v35  ;;  %v183_v37 = vpop.permute.xlu1 %182  ;;  %v336_v28 = vpack.c.bf16 %v320_v19, %v320_v19  ;;  %v328_v3 = vld [vmem:[#allocation2 + $0x60] sm:$0xff] }
 0x11a   :  { %160 = vst.msk [vmem:[#allocation2 + $0x48] sm:$0xff] %vm120_vm1, %v149_v36  ;;  %v324_v35 = vld [vmem:[#allocation2 + $0x40] sm:$0xff]  ;;  %v344_v12 = vpack.c.bf16 %v328_v3, %v328_v3 }
 0x11b   :  { %194 = vst.msk [vmem:[#allocation2 + $0x88] sm:$0xff] %vm120_vm1, %v183_v37  ;;  %v474_v36 = vunpack.c.l.b16 %v336_v28 }
 0x120   :  { %v202_v41 = vpop.permute.xlu0 %201  ;;  %v221_v42 = vpop.permute.xlu2 %220  ;;  %v351_v43 = vld [vmem:[#allocation2 + $0x98] sm:$0xff] }
 0x121   :  { %212 = vst.msk [vmem:[#allocation2 + $0xb0] sm:$0xff] %vm120_vm1, %v202_v41  ;;  %v219_v44 = vpop.permute.xlu1 %218  ;;  %v367_v45 = vpack.c.bf16 %v351_v43, %v351_v43  ;;  %v325_v31 = vld [vmem:[#allocation2 + $0x48] sm:$0xff] }
 0x122   :  { %230 = vst.msk [vmem:[#allocation2 + $0xd8] sm:$0xff] %vm120_vm1, %v221_v42  ;;  %v349_v47 = vld [vmem:[#allocation2 + $0x88] sm:$0xff]  ;;  %v341_v39 = vpack.c.bf16 %v325_v31, %v325_v31  ;;  %v340_v42 = vpack.c.bf16 %v324_v35, %v324_v35 }
 0x123   :  { %229 = vst.msk [vmem:[#allocation2 + $0xd0] sm:$0xff] %vm120_vm1, %v219_v44  ;;  %v450_v50 = vunpack.c.l.b16 %v367_v45  ;;  %v365_v51 = vpack.c.bf16 %v349_v47, %v349_v47 }
 0x124   :  { %v535_v46 = vunpack.c.l.b16 %v341_v39  ;;  %v534_v47 = vunpack.c.l.b16 %v340_v42 }
 0x125   :  { %v451_v54 = vpack.c.b16 %v450_v50, %v449_v49  ;;  %v420_v56 = vunpack.c.l.b16 %v365_v51  ;;  %v360_v49 = vld [vmem:[#allocation2 + $0xe0] sm:$0xff] }
 0x126   :  { %v536_v50 = vpack.c.b16 %v535_v46, %v534_v47 }
 0x127   :  { %v456_v59 = vsel %vm120_vm1, %v451_v54, 0  ;;  %v421_v60 = vpack.c.b16 %v420_v56, %v419_v55  ;;  %v376_v54 = vpack.c.bf16 %v360_v49, %v360_v49 }
 0x128   :  { %465 = vmatpush.bf16.xpose.msra.mxu2 %v456_v59  ;;  %v217_v63 = vpop.permute.xlu0 %216  ;;  %v153_v0 = vpop.permute.xlu2 %152  ;;  %v354_v52 = vld [vmem:[#allocation2 + $0xb0] sm:$0xff] }
 0x129   :  { %228 = vst.msk [vmem:[#allocation2 + $0xc8] sm:$0xff] %vm120_vm1, %v217_v63  ;;  %v426_v1 = vsel %vm120_vm1, %v421_v60, 0  ;;  %v132_v2 = vpop.permute.xlu1 %131  ;;  %v359_v5 = vld [vmem:[#allocation2 + $0xd8] sm:$0xff]  ;;  %v370_v60 = vpack.c.bf16 %v354_v52, %v354_v52 }
 0x12a   :  { %162 = vst.msk [vmem:[#allocation2 + $0x58] sm:$0xff] %vm120_vm1, %v153_v0  ;;  %435 = vmatpush.bf16.xpose.msrb.mxu1 %v426_v1  ;;  %v358_v6 = vld [vmem:[#allocation2 + $0xd0] sm:$0xff]  ;;  %v375_v7 = vpack.c.bf16 %v359_v5, %v359_v5  ;;  %v599_v1 = vunpack.c.l.b16 %v376_v54 }
 0x12b   :  { %143 = vst.msk [vmem:[#allocation2 + $0x28] sm:$0xff] %vm120_vm1, %v132_v2  ;;  %v374_v10 = vpack.c.bf16 %v358_v6, %v358_v6  ;;  %v509_v5 = vunpack.c.l.b16 %v370_v60 }
 0x12c   :  { %v570_v11 = vunpack.c.l.b16 %v375_v7 }
 0x12d   :  { %v569_v18 = vunpack.c.l.b16 %v374_v10 }
 0x12f   :  { %1539 = vmatmul.msk.bf16.vlgmr.msra.gmra.mxu2 %vm120_vm1, %v446_v15  ;;  %v571_v21 = vpack.c.b16 %v570_v11, %v569_v18 }
 0x130   :  { %v134_v23 = vpop.permute.xlu0 %133  ;;  %v168_v24 = vpop.permute.xlu2 %167  ;;  %v357_v25 = vld [vmem:[#allocation2 + $0xc8] sm:$0xff] }
 0x131   :  { %1538 = vmatmul.msk.bf16.vlgmr.msrb.gmra.mxu1 %vm120_vm1, %v416_v20  ;;  %144 = vst.msk [vmem:[#allocation2 + $0x30] sm:$0xff] %vm120_vm1, %v134_v23  ;;  %v576_v26 = vsel %vm120_vm1, %v571_v21, 0  ;;  %v151_v27 = vpop.permute.xlu1 %150  ;;  %v373_v29 = vpack.c.bf16 %v357_v25, %v357_v25  ;;  %v327_v51 = vld [vmem:[#allocation2 + $0x58] sm:$0xff] }
 0x132   :  { %178 = vst.msk [vmem:[#allocation2 + $0x70] sm:$0xff] %vm120_vm1, %v168_v24  ;;  %585 = vmatpush.bf16.xpose.msrb.mxu3 %v576_v26  ;;  %v321_v30 = vld [vmem:[#allocation2 + $0x28] sm:$0xff]  ;;  %v343_v59 = vpack.c.bf16 %v327_v51, %v327_v51  ;;  %v594_v24 = vunpack.c.l.b16 %v344_v12 }
 0x133   :  { %161 = vst.msk [vmem:[#allocation2 + $0x50] sm:$0xff] %vm120_vm1, %v151_v27  ;;  %v337_v32 = vpack.c.bf16 %v321_v30, %v321_v30  ;;  %v540_v34 = vunpack.c.l.b16 %v373_v29 }
 0x134   :  { %v565_v4 = vunpack.c.l.b16 %v343_v59 }
 0x135   :  { %v475_v37 = vunpack.c.l.b16 %v337_v32  ;;  %v541_v38 = vpack.c.b16 %v540_v34, %v539_v33 }
 0x137   :  { %v476_v40 = vpack.c.b16 %v475_v37, %v474_v36  ;;  %v546_v41 = vsel %vm120_vm1, %v541_v38, 0 }
 0x138   :  { %v234_v43 = vpop.permute.xlu0 %233  ;;  %555 = vmatpush.bf16.xpose.msrb.mxu2 %v546_v41  ;;  %v251_v44 = vpop.permute.xlu2 %250  ;;  %v322_v8 = vld [vmem:[#allocation2 + $0x30] sm:$0xff] }
 0x139   :  { %1540 = vmatmul.msk.bf16.vlgmr.msra.gmra.mxu3 %vm120_vm1, %v476_v40  ;;  %245 = vst.msk [vmem:[#allocation2 + $0xe8] sm:$0xff] %vm120_vm1, %v234_v43  ;;  %v204_v45 = vpop.permute.xlu1 %203  ;;  %v338_v20 = vpack.c.bf16 %v322_v8, %v322_v8  ;;  %v330_v38 = vld [vmem:[#allocation2 + $0x70] sm:$0xff] }
 0x13a   :  { %262 = vst.msk [vmem:[#allocation2 + $0x108] sm:$0xff] %vm120_vm1, %v251_v44  ;;  %v326_v48 = vld [vmem:[#allocation2 + $0x50] sm:$0xff]  ;;  %v346_v41 = vpack.c.bf16 %v330_v38, %v330_v38 }
 0x13b   :  { %213 = vst.msk [vmem:[#allocation2 + $0xb8] sm:$0xff] %vm120_vm1, %v204_v45  ;;  %v342_v53 = vpack.c.bf16 %v326_v48, %v326_v48  ;;  %v504_v26 = vunpack.c.l.b16 %v338_v20 }
 0x13d   :  { %v564_v63 = vunpack.c.l.b16 %v342_v53 }
 0x13f   :  { %1542 = vmatmul.msk.bf16.vlgmr.msrb.gmra.mxu2 %vm120_vm1, %v536_v50  ;;  %v566_v9 = vpack.c.b16 %v565_v4, %v564_v63  ;;  %v624_v50 = vunpack.c.l.b16 %v346_v41 }
 0x140   :  { %v166_v55 = vpop.permute.xlu0 %165  ;;  %v272_v56 = vpop.permute.xlu2 %271  ;;  %v361_v57 = vld [vmem:[#allocation2 + $0xe8] sm:$0xff] }
 0x141   :  { %177 = vst.msk [vmem:[#allocation2 + $0x68] sm:$0xff] %vm120_vm1, %v166_v55  ;;  %v136_v58 = vpop.permute.xlu1 %135  ;;  %v377_v61 = vpack.c.bf16 %v361_v57, %v361_v57  ;;  %v381_v39 = vld [vmem:[#allocation2 + $0x108] sm:$0xff] }
 0x142   :  { %281 = vst.msk [vmem:[#allocation2 + $0x138] sm:$0xff] %vm120_vm1, %v272_v56  ;;  %v355_v62 = vld [vmem:[#allocation2 + $0xb8] sm:$0xff]  ;;  %v397_v45 = vpack.c.bf16 %v381_v39, %v381_v39 }
 0x143   :  { %145 = vst.msk [vmem:[#allocation2 + $0x38] sm:$0xff] %vm120_vm1, %v136_v58  ;;  %v371_v0 = vpack.c.bf16 %v355_v62, %v355_v62  ;;  %v600_v2 = vunpack.c.l.b16 %v377_v61 }
 0x144   :  { %v853_v53 = vunpack.c.l.b16 %v397_v45 }
 0x145   :  { %v510_v6 = vunpack.c.l.b16 %v371_v0  ;;  %v601_v7 = vpack.c.b16 %v600_v2, %v599_v1 }
 0x147   :  { %v511_v10 = vpack.c.b16 %v510_v6, %v509_v5  ;;  %v606_v11 = vsel %vm120_vm1, %v601_v7, 0 }
 0x148   :  { %v236_v14 = vpop.permute.xlu0 %235  ;;  %615 = vmatpush.bf16.xpose.msrb.mxu0 %v606_v11  ;;  %v329_v15 = vld [vmem:[#allocation2 + $0x68] sm:$0xff] }
 0x149   :  { %1543 = vmatmul.msk.bf16.vlgmr.msrb.gmra.mxu3 %vm120_vm1, %v566_v9  ;;  %246 = vst.msk [vmem:[#allocation2 + $0xf0] sm:$0xff] %vm120_vm1, %v236_v14  ;;  %v516_v18 = vsel %vm120_vm1, %v511_v10, 0  ;;  %v238_v19 = vpop.permute.xlu1 %237  ;;  %v345_v21 = vpack.c.bf16 %v329_v15, %v329_v15  ;;  %v387_v55 = vld [vmem:[#allocation2 + $0x138] sm:$0xff] }
 0x14a   :  { %525 = vmatpush.bf16.xpose.msra.mxu1 %v516_v18  ;;  %247 = vst.msk [vmem:[#allocation2 + $0xf8] sm:$0xff] %vm120_vm1, %v238_v19  ;;  %v323_v22 = vld [vmem:[#allocation2 + $0x38] sm:$0xff]  ;;  %v403_v58 = vpack.c.bf16 %v387_v55, %v387_v55 }
 0x14b   :  { %v339_v23 = vpack.c.bf16 %v323_v22, %v323_v22  ;;  %v595_v25 = vunpack.c.l.b16 %v345_v21 }
 0x14c   :  { %v937_v63 = vunpack.c.l.b16 %v403_v58 }
 0x14d   :  { %v505_v27 = vunpack.c.l.b16 %v339_v23  ;;  %v596_v28 = vpack.c.b16 %v595_v25, %v594_v24 }
 0x14f   :  { %v506_v29 = vpack.c.b16 %v505_v27, %v504_v26  ;;  %1544 = vmatmul.msk.bf16.vlgmr.msrb.gmra.mxu0 %vm120_vm1, %v596_v28 }
 0x150   :  { %v170_v30 = vpop.permute.xlu0 %169  ;;  %v362_v31 = vld [vmem:[#allocation2 + $0xf0] sm:$0xff] }
 0x151   :  { %1541 = vmatmul.msk.bf16.vlgmr.msra.gmra.mxu1 %vm120_vm1, %v506_v29  ;;  %179 = vst.msk [vmem:[#allocation2 + $0x78] sm:$0xff] %vm120_vm1, %v170_v30  ;;  %v249_v32 = vpop.permute.xlu1 %248  ;;  %v363_v33 = vld [vmem:[#allocation2 + $0xf8] sm:$0xff]  ;;  %v378_v34 = vpack.c.bf16 %v362_v31, %v362_v31 }
 0x152   :  { %261 = vst.msk [vmem:[#allocation2 + $0x100] sm:$0xff] %vm120_vm1, %v249_v32  ;;  %v379_v35 = vpack.c.bf16 %v363_v33, %v363_v33 }
 0x153   :  { %v629_v36 = vunpack.c.l.b16 %v378_v34 }
 0x154   :  { %v630_v37 = vunpack.c.l.b16 %v379_v35 }
 0x156   :  { %v631_v40 = vpack.c.b16 %v630_v37, %v629_v36 }
 0x158   :  { %v266_v42 = vpop.permute.xlu0 %265  ;;  %v636_v43 = vsel %vm120_vm1, %v631_v40, 0  ;;  %v331_v44 = vld [vmem:[#allocation2 + $0x78] sm:$0xff] }
 0x159   :  { %278 = vst.msk [vmem:[#allocation2 + $0x120] sm:$0xff] %vm120_vm1, %v266_v42  ;;  %v270_v46 = vpop.permute.xlu1 %269  ;;  %645 = vmatpush.bf16.xpose.msrb.mxu1 %v636_v43  ;;  %v347_v47 = vpack.c.bf16 %v331_v44, %v331_v44  ;;  %v380_v48 = vld [vmem:[#allocation2 + $0x100] sm:$0xff] }
 0x15a   :  { %280 = vst.msk [vmem:[#allocation2 + $0x130] sm:$0xff] %vm120_vm1, %v270_v46  ;;  %v396_v49 = vpack.c.bf16 %v380_v48, %v380_v48 }
 0x15b   :  { %v625_v51 = vunpack.c.l.b16 %v347_v47 }
 0x15c   :  { %v852_v52 = vunpack.c.l.b16 %v396_v49 }
 0x15d   :  { %v626_v54 = vpack.c.b16 %v625_v51, %v624_v50 }
 0x15e   :  { %v854_v56 = vpack.c.b16 %v853_v53, %v852_v52 }
 0x160   :  { %866 = vmatpush.bf16.msra.mxu2 %v854_v56  ;;  %v253_v57 = vpop.permute.xlu0 %252  ;;  %v384_v3 = vld [vmem:[#allocation2 + $0x120] sm:$0xff] }
 0x161   :  { %1545 = vmatmul.msk.bf16.vlgmr.msrb.gmra.mxu1 %vm120_vm1, %v626_v54  ;;  %263 = vst.msk [vmem:[#allocation2 + $0x110] sm:$0xff] %vm120_vm1, %v253_v57  ;;  %v300_v59 = vpop.permute.xlu1 %299  ;;  %v386_v60 = vld [vmem:[#allocation2 + $0x130] sm:$0xff]  ;;  %v400_v5 = vpack.c.bf16 %v384_v3, %v384_v3 }
 0x162   :  { %312 = vst.msk [vmem:[#allocation2 + $0x160] sm:$0xff] %vm120_vm1, %v300_v59  ;;  %v402_v61 = vpack.c.bf16 %v386_v60, %v386_v60 }
 0x163   :  { %v908_v8 = vunpack.c.l.b16 %v400_v5 }
 0x164   :  { %v936_v62 = vunpack.c.l.b16 %v402_v61 }
 0x166   :  { %v938_v0 = vpack.c.b16 %v937_v63, %v936_v62 }
 0x168   :  { %950 = vmatpush.bf16.msra.mxu1 %v938_v0  ;;  %v283_v1 = vpop.permute.xlu0 %282  ;;  %v382_v10 = vld [vmem:[#allocation2 + $0x110] sm:$0xff] }
 0x169   :  { %295 = vst.msk [vmem:[#allocation2 + $0x140] sm:$0xff] %vm120_vm1, %v283_v1  ;;  %v268_v2 = vpop.permute.xlu1 %267  ;;  %v398_v12 = vpack.c.bf16 %v382_v10, %v382_v10 }
 0x16a   :  { %279 = vst.msk [vmem:[#allocation2 + $0x128] sm:$0xff] %vm120_vm1, %v268_v2 }
 0x16b   :  { %v880_v19 = vunpack.c.l.b16 %v398_v12 }
 0x170   :  { %v255_v4 = vpop.permute.xlu0 %254  ;;  %v388_v21 = vld [vmem:[#allocation2 + $0x140] sm:$0xff] }
 0x171   :  { %264 = vst.msk [vmem:[#allocation2 + $0x118] sm:$0xff] %vm120_vm1, %v255_v4  ;;  %v385_v6 = vld [vmem:[#allocation2 + $0x128] sm:$0xff]  ;;  %v404_v23 = vpack.c.bf16 %v388_v21, %v388_v21 }
 0x172   :  { %v401_v7 = vpack.c.bf16 %v385_v6, %v385_v6 }
 0x173   :  { %v964_v26 = vunpack.c.l.b16 %v404_v23 }
 0x174   :  { %v909_v9 = vunpack.c.l.b16 %v401_v7 }
 0x176   :  { %v910_v11 = vpack.c.b16 %v909_v9, %v908_v8 }
 0x178   :  { %922 = vmatpush.bf16.msra.mxu0 %v910_v11  ;;  %v285_v14 = vpop.permute.xlu0 %284  ;;  %v383_v15 = vld [vmem:[#allocation2 + $0x118] sm:$0xff] }
 0x179   :  { %296 = vst.msk [vmem:[#allocation2 + $0x148] sm:$0xff] %vm120_vm1, %v285_v14  ;;  %v399_v18 = vpack.c.bf16 %v383_v15, %v383_v15 }
 0x17b   :  { %v881_v20 = vunpack.c.l.b16 %v399_v18 }
 0x17d   :  { %v882_v22 = vpack.c.b16 %v881_v20, %v880_v19 }
 0x17f   :  { %894 = vmatpush.bf16.msra.mxu3 %v882_v22 }
 0x180   :  { %v389_v24 = vld [vmem:[#allocation2 + $0x148] sm:$0xff] }
 0x181   :  { %v405_v25 = vpack.c.bf16 %v389_v24, %v389_v24 }
 0x183   :  { %v965_v27 = vunpack.c.l.b16 %v405_v25 }
 0x185   :  { %v966_v28 = vpack.c.b16 %v965_v27, %v964_v26 }
 0x187   :  { %978 = vmatpush.bf16.msrb.mxu2 %v966_v28 }
 0x1ae   :  { %v437_v29 = vpop.f32.mrf.mxu1 }
 0x1af   :  { %v653_v30 = vsel %vm652_vm2, %v437_v29, -inf }
 0x1b0   :  { %654 = vmax.xlane.f32.xlu1 %v653_v30 }
 0x1b2   :  { %v2011_v31 = vpop.f32.mrf.mxu2 }
 0x1b3   :  { %v659_v46 = vsel %vm652_vm2, %v2011_v31, -inf }
 0x1b6   :  { %v439_v32 = vpop.f32.mrf.mxu1 }
 0x1b7   :  { %v656_v33 = vsel %vm652_vm2, %v439_v32, -inf }
 0x1b8   :  { %657 = vmax.xlane.f32.xlu2 %v656_v33 }
 0x1ba   :  { %v2014_v34 = vpop.f32.mrf.mxu2 }
 0x1bb   :  { %v662_v56 = vsel %vm652_vm2, %v2014_v34, -inf }
 0x1bc   :  { %v497_v35 = vpop.f32.mrf.mxu3 }
 0x1bd   :  { %v665_v36 = vsel %vm652_vm2, %v497_v35, -inf }
 0x1be   :  { %666 = vmax.xlane.f32.xlu0 %v665_v36 }
 0x1c2   :  { %v557_v37 = vpop.f32.mrf.mxu2 }
 0x1c3   :  { %v677_v38 = vsel %vm652_vm2, %v557_v37, -inf }
 0x1c4   :  { %v2018_v39 = vpop.f32.mrf.mxu3 }
 0x1c5   :  { %v668_v52 = vsel %vm652_vm2, %v2018_v39, -inf }
 0x1c6   :  { %678 = vmax.xlane.f32.xlu0 %v677_v38 }
 0x1ca   :  { %v2037_v50 = vpop.f32.mrf.mxu2 }
 0x1cb   :  { %v680_v51 = vsel %vm652_vm2, %v2037_v50, -inf }
 0x1cc   :  { %v2020_v40 = vpop.f32.mrf.mxu3  ;;  %v2022_v41 = vpop.f32.mrf.mxu0 }
 0x1cd   :  { %v683_v42 = vsel %vm652_vm2, %v2020_v40, -inf  ;;  %v689_v43 = vsel %vm652_vm2, %v2022_v41, -inf }
 0x1ce   :  { %684 = vmax.xlane.f32.xlu0 %v683_v42  ;;  %v2028_v44 = vpop.f32.mrf.mxu1  ;;  %690 = vmax.xlane.f32.xlu1 %v689_v43 }
 0x1cf   :  { %v671_v59 = vsel %vm652_vm2, %v2028_v44, -inf }
 0x1d4   :  { %v2030_v45 = vpop.f32.mrf.mxu0  ;;  %v2045_v54 = vpop.f32.mrf.mxu3 }
 0x1d5   :  { %v692_v47 = vsel %vm652_vm2, %v2030_v45, -inf  ;;  %v686_v55 = vsel %vm652_vm2, %v2045_v54, -inf }
 0x1d6   :  { %v529_v48 = vpop.f32.mrf.mxu1  ;;  %660 = vmax.xlane.f32.xlu1 %v659_v46  ;;  %693 = vmax.xlane.f32.xlu2 %v692_v47 }
 0x1d7   :  { %v674_v49 = vsel %vm652_vm2, %v529_v48, -inf }
 0x1d8   :  { %675 = vmax.xlane.f32.xlu0 %v674_v49 }
 0x1de   :  { %v2043_v53 = vpop.f32.mrf.mxu1  ;;  %681 = vmax.xlane.f32.xlu1 %v680_v51  ;;  %669 = vmax.xlane.f32.xlu2 %v668_v52 }
 0x1df   :  { %v695_v60 = vsel %vm652_vm2, %v2043_v53, -inf }
 0x1e6   :  { %v2051_v57 = vpop.f32.mrf.mxu1  ;;  %687 = vmax.xlane.f32.xlu1 %v686_v55  ;;  %663 = vmax.xlane.f32.xlu2 %v662_v56 }
 0x1e7   :  { %v698_v58 = vsel %vm652_vm2, %v2051_v57, -inf }
 0x1e8   :  { %699 = vmax.xlane.f32.xlu0 %v698_v58 }
 0x1ee   :  { %672 = vmax.xlane.f32.xlu2 %v671_v59 }
 0x1f6   :  { %696 = vmax.xlane.f32.xlu2 %v695_v60 }
 0x20e   :  { %301 = vrot.lane.b32.xlu2 %v1910_v16, %s1827_s7 }
 0x223   :  { %v655_v61 = vpop.xlane.xlu1 %654 }
 0x224   :  { %v701_v62 = vsub.f32 %v437_v29, %v655_v61 }
 0x226   :  { %v717_v63 = vmul.f32 1.442695, %v701_v62 }
 0x228   :  { %1625 = vpow2.f32 %v717_v63 }
 0x22b   :  { %v658_v0 = vpop.xlane.xlu2 %657 }
 0x22c   :  { %v702_v1 = vsub.f32 %v439_v32, %v658_v0 }
 0x22e   :  { %v2061_v2 = vpop.eup %1625  ;;  %v719_v3 = vmul.f32 1.442695, %v702_v1 }
 0x22f   :  { %v749_v4 = vsel %vm652_vm2, %v2061_v2, 0.0 }
 0x230   :  { %1627 = vpow2.f32 %v719_v3  ;;  %750 = vadd.xlane.f32.xlu0 %v749_v4 }
 0x231   :  { %v667_v5 = vpop.xlane.xlu0 %666 }
 0x232   :  { %v705_v6 = vsub.f32 %v497_v35, %v667_v5 }
 0x234   :  { %v725_v7 = vmul.f32 1.442695, %v705_v6 }
 0x236   :  { %v2065_v8 = vpop.eup %1627  ;;  %1629 = vpow2.f32 %v725_v7 }
 0x237   :  { %v752_v16 = vsel %vm652_vm2, %v2065_v8, 0.0 }
 0x238   :  { %753 = vadd.xlane.f32.xlu0 %v752_v16 }
 0x239   :  { %v679_v9 = vpop.xlane.xlu0 %678 }
 0x23a   :  { %v709_v10 = vsub.f32 %v557_v37, %v679_v9 }
 0x23c   :  { %v2069_v11 = vpop.eup %1629  ;;  %v733_v12 = vmul.f32 1.442695, %v709_v10 }
 0x23d   :  { %v761_v14 = vsel %vm652_vm2, %v2069_v11, 0.0 }
 0x23e   :  { %1631 = vpow2.f32 %v733_v12  ;;  %762 = vadd.xlane.f32.xlu2 %v761_v14  ;;  %v392_v14 = vld [vmem:[#allocation2 + $0x160] sm:$0xff] }
 0x241   :  { %v691_v15 = vpop.xlane.xlu1 %690  ;;  %v685_v18 = vpop.xlane.xlu0 %684 }
 0x242   :  { %v713_v37 = vsub.f32 %v2022_v41, %v691_v15  ;;  %v711_v63 = vsub.f32 %v2020_v40, %v685_v18  ;;  %v408_v18 = vpack.c.bf16 %v392_v14, %v392_v14 }
 0x244   :  { %v2073_v19 = vpop.eup %1631  ;;  %v741_v46 = vmul.f32 1.442695, %v713_v37  ;;  %v737_v3 = vmul.f32 1.442695, %v711_v63 }
 0x245   :  { %v773_v20 = vsel %vm652_vm2, %v2073_v19, 0.0 }
 0x246   :  { %774 = vadd.xlane.f32.xlu0 %v773_v20 }
 0x249   :  { %v661_v21 = vpop.xlane.xlu1 %660  ;;  %v694_v22 = vpop.xlane.xlu2 %693 }
 0x24a   :  { %v703_v23 = vsub.f32 %v2011_v31, %v661_v21  ;;  %v714_v27 = vsub.f32 %v2030_v45, %v694_v22  ;;  %v1020_v22 = vunpack.c.l.b16 %v408_v18 }
 0x24b   :  { %v676_v24 = vpop.xlane.xlu0 %675 }
 0x24c   :  { %v721_v25 = vmul.f32 1.442695, %v703_v23  ;;  %v708_v26 = vsub.f32 %v529_v48, %v676_v24  ;;  %v743_v29 = vmul.f32 1.442695, %v714_v27 }
 0x24e   :  { %1633 = vpow2.f32 %v721_v25  ;;  %v731_v28 = vmul.f32 1.442695, %v708_v26 }
 0x250   :  { %1635 = vpow2.f32 %v731_v28 }
 0x251   :  { %v682_v30 = vpop.xlane.xlu1 %681  ;;  %v670_v32 = vpop.xlane.xlu2 %669  ;;  %1637 = vpow2.f32 %v743_v29 }
 0x252   :  { %v710_v33 = vsub.f32 %v2037_v50, %v682_v30  ;;  %v706_v35 = vsub.f32 %v2018_v39, %v670_v32 }
 0x254   :  { %v2081_v36 = vpop.eup %1633  ;;  %v735_v31 = vmul.f32 1.442695, %v710_v33  ;;  %v727_v38 = vmul.f32 1.442695, %v706_v35 }
 0x255   :  { %v755_v42 = vsel %vm652_vm2, %v2081_v36, 0.0 }
 0x256   :  { %v2086_v43 = vpop.eup %1635  ;;  %1639 = vpow2.f32 %v735_v31  ;;  %756 = vadd.xlane.f32.xlu2 %v755_v42 }
 0x257   :  { %1641 = vpow2.f32 %v727_v38  ;;  %v770_v45 = vsel %vm652_vm2, %v2086_v43, 0.0  ;;  %v2091_v48 = vpop.eup %1637 }
 0x258   :  { %771 = vadd.xlane.f32.xlu0 %v770_v45  ;;  %1643 = vpow2.f32 %v741_v46 }
 0x259   :  { %v688_v39 = vpop.xlane.xlu1 %687  ;;  %v664_v47 = vpop.xlane.xlu2 %663 }
 0x25a   :  { %v704_v41 = vsub.f32 %v2014_v34, %v664_v47  ;;  %v712_v50 = vsub.f32 %v2045_v54, %v688_v39  ;;  %v788_v34 = vsel %vm652_vm2, %v2091_v48, 0.0 }
 0x25b   :  { %v700_v25 = vpop.xlane.xlu0 %699 }
 0x25c   :  { %v2093_v49 = vpop.eup %1639  ;;  %v723_v51 = vmul.f32 1.442695, %v704_v41  ;;  %v739_v58 = vmul.f32 1.442695, %v712_v50  ;;  %v716_v26 = vsub.f32 %v2051_v57, %v700_v25 }
 0x25d   :  { %v2096_v52 = vpop.eup %1641  ;;  %v776_v55 = vsel %vm652_vm2, %v2093_v49, 0.0 }
 0x25e   :  { %v764_v56 = vsel %vm652_vm2, %v2096_v52, 0.0  ;;  %777 = vadd.xlane.f32.xlu2 %v776_v55  ;;  %1645 = vpow2.f32 %v723_v51  ;;  %v2104_v60 = vpop.eup %1643  ;;  %v747_v27 = vmul.f32 1.442695, %v716_v26 }
 0x25f   :  { %765 = vadd.xlane.f32.xlu1 %v764_v56  ;;  %1647 = vpow2.f32 %v739_v58  ;;  %v785_v0 = vsel %vm652_vm2, %v2104_v60, 0.0 }
 0x260   :  { %789 = vadd.xlane.f32.xlu0 %v788_v34 }
 0x261   :  { %v673_v59 = vpop.xlane.xlu2 %672 }
 0x262   :  { %v707_v54 = vsub.f32 %v2028_v44, %v673_v59 }
 0x264   :  { %v729_v61 = vmul.f32 1.442695, %v707_v54  ;;  %v2107_v62 = vpop.eup %1645 }
 0x265   :  { %v758_v1 = vsel %vm652_vm2, %v2107_v62, 0.0  ;;  %v2114_v5 = vpop.eup %1647 }
 0x266   :  { %1649 = vpow2.f32 %v729_v61  ;;  %786 = vadd.xlane.f32.xlu2 %v785_v0  ;;  %v782_v16 = vsel %vm652_vm2, %v2114_v5, 0.0 }
 0x267   :  { %759 = vadd.xlane.f32.xlu1 %v758_v1  ;;  %1651 = vpow2.f32 %v737_v3 }
 0x269   :  { %v697_v4 = vpop.xlane.xlu2 %696 }
 0x26a   :  { %v715_v44 = vsub.f32 %v2043_v53, %v697_v4 }
 0x26c   :  { %v2117_v6 = vpop.eup %1649  ;;  %v745_v7 = vmul.f32 1.442695, %v715_v44 }
 0x26d   :  { %v767_v40 = vsel %vm652_vm2, %v2117_v6, 0.0  ;;  %v2124_v10 = vpop.eup %1651 }
 0x26e   :  { %1653 = vpow2.f32 %v745_v7  ;;  %783 = vadd.xlane.f32.xlu2 %v782_v16  ;;  %v779_v15 = vsel %vm652_vm2, %v2124_v10, 0.0 }
 0x26f   :  { %768 = vadd.xlane.f32.xlu1 %v767_v40  ;;  %1655 = vpow2.f32 %v747_v27 }
 0x271   :  { %v302_v9 = vpop.permute.xlu2 %301 }
 0x272   :  { %313 = vst.msk [vmem:[#allocation2 + $0x168] sm:$0xff] %vm120_vm1, %v302_v9 }
 0x274   :  { %v2126_v12 = vpop.eup %1653  ;;  %286 = vrot.lane.b32.xlu0 %v1903_v13, %s1828_s8 }
 0x275   :  { %v791_v53 = vsel %vm652_vm2, %v2126_v12, 0.0  ;;  %v2141_v29 = vpop.eup %1655 }
 0x276   :  { %792 = vadd.xlane.f32.xlu2 %v791_v53  ;;  %v794_v33 = vsel %vm652_vm2, %v2141_v29, 0.0 }
 0x277   :  { %780 = vadd.xlane.f32.xlu1 %v779_v15 }
 0x279   :  { %v393_v20 = vld [vmem:[#allocation2 + $0x168] sm:$0xff] }
 0x27a   :  { %v409_v21 = vpack.c.bf16 %v393_v20, %v393_v20 }
 0x27c   :  { %288 = vrot.lane.b32.xlu0 %v1912_v17, %s1828_s8  ;;  %v1021_v23 = vunpack.c.l.b16 %v409_v21 }
 0x27e   :  { %v1022_v24 = vpack.c.b16 %v1021_v23, %v1020_v22 }
 0x280   :  { %1034 = vmatpush.bf16.msrb.mxu0 %v1022_v24 }
 0x284   :  { %303 = vrot.lane.b32.xlu0 %v1903_v13, %s1827_s7 }
 0x290   :  { %305 = vrot.lane.b32.xlu1 %v1912_v17, %s1827_s7 }
 0x2a3   :  { %v751_v28 = vpop.xlane.xlu0 %750 }
 0x2a4   :  { %1657 = vrcp.f32 %v751_v28 }
 0x2aa   :  { %v1658_v32 = vpop.eup %1657 }
 0x2ab   :  { %v754_v30 = vpop.xlane.xlu0 %753  ;;  %v813_v13 = vmul.f32 %v1658_v32, %v2061_v2 }
 0x2ac   :  { %1659 = vrcp.f32 %v754_v30 }
 0x2ad   :  { %v829_v17 = vpack.c.bf16 %v813_v13, %v813_v13 }
 0x2ae   :  { %795 = vadd.xlane.f32.xlu0 %v794_v33 }
 0x2af   :  { %v847_v31 = vunpack.c.l.b16 %v829_v17 }
 0x2b1   :  { %v763_v45 = vpop.xlane.xlu2 %762 }
 0x2b2   :  { %v1660_v35 = vpop.eup %1659 }
 0x2b3   :  { %v814_v37 = vmul.f32 %v1660_v35, %v2065_v8 }
 0x2b5   :  { %v830_v57 = vpack.c.bf16 %v814_v37, %v814_v37 }
 0x2b7   :  { %v848_v38 = vunpack.c.l.b16 %v830_v57 }
 0x2b9   :  { %v849_v42 = vpack.c.b16 %v848_v38, %v847_v31  ;;  %v775_v46 = vpop.xlane.xlu0 %774 }
 0x2ba   :  { %1661 = vrcp.f32 %v775_v46 }
 0x2bb   :  { %1546 = vmatmul.msk.bf16.vlgmr.msra.gmra.mxu2 %vm652_vm2, %v849_v42  ;;  %1663 = vrcp.f32 %v763_v45 }
 0x2c0   :  { %v1662_v50 = vpop.eup %1661 }
 0x2c1   :  { %v1664_v2 = vpop.eup %1663  ;;  %v821_v8 = vmul.f32 %v1662_v50, %v2073_v19 }
 0x2c2   :  { %v817_v55 = vmul.f32 %v1664_v2, %v2069_v11 }
 0x2c3   :  { %v837_v58 = vpack.c.bf16 %v821_v8, %v821_v8 }
 0x2c4   :  { %v833_v61 = vpack.c.bf16 %v817_v55, %v817_v55 }
 0x2c5   :  { %v959_v44 = vunpack.c.l.b16 %v837_v58 }
 0x2c6   :  { %v903_v11 = vunpack.c.l.b16 %v833_v61 }
 0x2c9   :  { %v757_v39 = vpop.xlane.xlu2 %756 }
 0x2cb   :  { %v772_v47 = vpop.xlane.xlu0 %771 }
 0x2d1   :  { %v778_v41 = vpop.xlane.xlu2 %777 }
 0x2d2   :  { %v766_v51 = vpop.xlane.xlu1 %765  ;;  %1665 = vrcp.f32 %v778_v41 }
 0x2d3   :  { %1667 = vrcp.f32 %v766_v51  ;;  %v790_v0 = vpop.xlane.xlu0 %789 }
 0x2d4   :  { %1669 = vrcp.f32 %v757_v39 }
 0x2d8   :  { %v1666_v56 = vpop.eup %1665 }
 0x2d9   :  { %v1668_v34 = vpop.eup %1667  ;;  %v822_v59 = vmul.f32 %v1666_v56, %v2093_v49  ;;  %v787_v54 = vpop.xlane.xlu2 %786 }
 0x2da   :  { %v818_v63 = vmul.f32 %v1668_v34, %v2096_v52  ;;  %v760_v1 = vpop.xlane.xlu1 %759  ;;  %1671 = vrcp.f32 %v787_v54  ;;  %v1670_v3 = vpop.eup %1669 }
 0x2db   :  { %v838_v4 = vpack.c.bf16 %v822_v59, %v822_v59  ;;  %1673 = vrcp.f32 %v760_v1  ;;  %v815_v40 = vmul.f32 %v1670_v3, %v2081_v36 }
 0x2dc   :  { %1675 = vrcp.f32 %v772_v47  ;;  %v834_v19 = vpack.c.bf16 %v818_v63, %v818_v63 }
 0x2dd   :  { %v960_v7 = vunpack.c.l.b16 %v838_v4  ;;  %1677 = vrcp.f32 %v790_v0  ;;  %v831_v15 = vpack.c.bf16 %v815_v40, %v815_v40 }
 0x2de   :  { %v904_v16 = vunpack.c.l.b16 %v834_v19 }
 0x2df   :  { %v961_v49 = vpack.c.b16 %v960_v7, %v959_v44  ;;  %v875_v36 = vunpack.c.l.b16 %v831_v15 }
 0x2e0   :  { %v1672_v9 = vpop.eup %1671  ;;  %v905_v53 = vpack.c.b16 %v904_v16, %v903_v11 }
 0x2e1   :  { %v1674_v14 = vpop.eup %1673  ;;  %1550 = vmatmul.msk.bf16.vlgmr.msrb.gmra.mxu2 %vm652_vm2, %v961_v49  ;;  %v825_v23 = vmul.f32 %v1672_v9, %v2104_v60  ;;  %v784_v28 = vpop.xlane.xlu2 %783 }
 0x2e2   :  { %v1676_v52 = vpop.eup %1675  ;;  %v816_v18 = vmul.f32 %v1674_v14, %v2107_v62  ;;  %v769_v20 = vpop.xlane.xlu1 %768  ;;  %1548 = vmatmul.msk.bf16.vlgmr.msra.gmra.mxu0 %vm652_vm2, %v905_v53 }
 0x2e3   :  { %v1678_v21 = vpop.eup %1677  ;;  %1679 = vrcp.f32 %v769_v20  ;;  %v820_v24 = vmul.f32 %v1676_v52, %v2086_v43  ;;  %v841_v62 = vpack.c.bf16 %v825_v23, %v825_v23 }
 0x2e4   :  { %v832_v22 = vpack.c.bf16 %v816_v18, %v816_v18  ;;  %v826_v25 = vmul.f32 %v1678_v21, %v2091_v48  ;;  %1681 = vrcp.f32 %v784_v28 }
 0x2e5   :  { %v836_v33 = vpack.c.bf16 %v820_v24, %v820_v24  ;;  %v1015_v43 = vunpack.c.l.b16 %v841_v62 }
 0x2e6   :  { %v876_v26 = vunpack.c.l.b16 %v832_v22  ;;  %v287_v27 = vpop.permute.xlu0 %286  ;;  %v842_v13 = vpack.c.bf16 %v826_v25, %v826_v25 }
 0x2e7   :  { %297 = vst.msk [vmem:[#allocation2 + $0x150] sm:$0xff] %vm120_vm1, %v287_v27  ;;  %v932_v48 = vunpack.c.l.b16 %v836_v33 }
 0x2e8   :  { %v877_v30 = vpack.c.b16 %v876_v26, %v875_v36  ;;  %v1016_v37 = vunpack.c.l.b16 %v842_v13  ;;  %v1595_v13 = vld [vmem:[#allocation4 + $0x8] sm:$0xff] }
 0x2e9   :  { %v1680_v32 = vpop.eup %1679  ;;  %v793_v44 = vpop.xlane.xlu2 %792  ;;  %1171 = vmatpush.bf16.msra.mxu2 %v1595_v13 }
 0x2ea   :  { %v819_v35 = vmul.f32 %v1680_v32, %v2117_v6  ;;  %v781_v17 = vpop.xlane.xlu1 %780  ;;  %1547 = vmatmul.msk.bf16.vlgmr.msra.gmra.mxu3 %vm652_vm2, %v877_v30  ;;  %v1682_v38 = vpop.eup %1681  ;;  %v1017_v42 = vpack.c.b16 %v1016_v37, %v1015_v43 }
 0x2eb   :  { %1683 = vrcp.f32 %v781_v17  ;;  %v824_v47 = vmul.f32 %v1682_v38, %v2114_v5 }
 0x2ec   :  { %v835_v60 = vpack.c.bf16 %v819_v35, %v819_v35  ;;  %1685 = vrcp.f32 %v793_v44  ;;  %v1594_v35 = vld [vmem:[#allocation4] sm:$0xff] }
 0x2ed   :  { %v840_v55 = vpack.c.bf16 %v824_v47, %v824_v47  ;;  %1172 = vmatpush.bf16.msra.mxu2 %v1594_v35 }
 0x2ee   :  { %v931_v57 = vunpack.c.l.b16 %v835_v60  ;;  %v289_v31 = vpop.permute.xlu0 %288  ;;  %v390_v6 = vld [vmem:[#allocation2 + $0x150] sm:$0xff] }
 0x2ef   :  { %298 = vst.msk [vmem:[#allocation2 + $0x158] sm:$0xff] %vm120_vm1, %v289_v31  ;;  %v406_v41 = vpack.c.bf16 %v390_v6, %v390_v6 }
 0x2f0   :  { %v933_v45 = vpack.c.b16 %v932_v48, %v931_v57 }
 0x2f1   :  { %v1684_v46 = vpop.eup %1683  ;;  %v992_v56 = vunpack.c.l.b16 %v406_v41 }
 0x2f2   :  { %v823_v39 = vmul.f32 %v1684_v46, %v2124_v10  ;;  %1549 = vmatmul.msk.bf16.vlgmr.msra.gmra.mxu1 %vm652_vm2, %v933_v45  ;;  %1552 = vmatmul.msk.bf16.vlgmr.msrb.gmra.mxu0 %vm652_vm2, %v1017_v42  ;;  %v988_v10 = vunpack.c.l.b16 %v840_v55  ;;  %v1686_v11 = vpop.eup %1685 }
 0x2f3   :  { %v827_v40 = vmul.f32 %v1686_v11, %v2126_v12  ;;  %v1711_v11 = vld [vmem:[%s2300_s0 + $0x18] sm:$0xff] }
 0x2f4   :  { %v839_v50 = vpack.c.bf16 %v823_v39, %v823_v39 }
 0x2f5   :  { %v843_v49 = vpack.c.bf16 %v827_v40, %v827_v40 }
 0x2f6   :  { %v304_v51 = vpop.permute.xlu0 %303  ;;  %v391_v2 = vld [vmem:[#allocation2 + $0x158] sm:$0xff]  ;;  %v987_v58 = vunpack.c.l.b16 %v839_v50 }
 0x2f7   :  { %314 = vst.msk [vmem:[#allocation2 + $0x170] sm:$0xff] %vm120_vm1, %v304_v51  ;;  %v407_v8 = vpack.c.bf16 %v391_v2, %v391_v2  ;;  %v1043_v14 = vunpack.c.l.b16 %v843_v49  ;;  %v2195_v2 = vld [vmem:[#allocation9] sm:$0xff]  ;;  %v1832_v49 = vmov 32.0  }
 0x2f8   :  { %v989_v54 = vpack.c.b16 %v988_v10, %v987_v58 }
 0x2f9   :  { %v993_v34 = vunpack.c.l.b16 %v407_v8  ;;  %v1146_v8 = vperm.slane %v2195_v2, 2 }
 0x2fb   :  { %v994_v59 = vpack.c.b16 %v993_v34, %v992_v56  ;;  %v1708_v34 = vld [vmem:[%s2300_s0] sm:$0xff] }
 0x2fd   :  { %1006 = vmatpush.bf16.msrb.mxu3 %v994_v59 }
 0x2fe   :  { %v394_v5 = vld [vmem:[#allocation2 + $0x170] sm:$0xff] }
 0x2ff   :  { %v410_v63 = vpack.c.bf16 %v394_v5, %v394_v5 }
 0x300   :  { %1551 = vmatmul.msk.bf16.vlgmr.msrb.gmra.mxu3 %vm652_vm2, %v989_v54 }
 0x301   :  { %v1048_v3 = vunpack.c.l.b16 %v410_v63 }
 0x302   :  { %v306_v61 = vpop.permute.xlu1 %305 }
 0x303   :  { %315 = vst.msk [vmem:[#allocation2 + $0x178] sm:$0xff] %vm120_vm1, %v306_v61  ;;  %v1709_v61 = vld [vmem:[%s2300_s0 + $0x8] sm:$0xff] }
 0x30a   :  { %v395_v0 = vld [vmem:[#allocation2 + $0x178] sm:$0xff] }
 0x30b   :  { %v411_v1 = vpack.c.bf16 %v395_v0, %v395_v0 }
 0x30d   :  { %v1049_v4 = vunpack.c.l.b16 %v411_v1 }
 0x30f   :  { %v1050_v19 = vpack.c.b16 %v1049_v4, %v1048_v3  ;;  %v1710_v3 = vld [vmem:[%s2300_s0 + $0x10] sm:$0xff] }
 0x311   :  { %1062 = vmatpush.bf16.msrb.mxu1 %v1050_v19 }
 0x321   :  { %v796_v7 = vpop.xlane.xlu0 %795 }
 0x322   :  { %1687 = vrcp.f32 %v796_v7 }
 0x323   :  { %1689 = vrcp.f32 %v1832_v49 }
 0x328   :  { %v1688_v16 = vpop.eup %1687 }
 0x329   :  { %v828_v9 = vmul.f32 %v1688_v16, %v2141_v29 }
 0x32b   :  { %v844_v53 = vpack.c.bf16 %v828_v9, %v828_v9  ;;  %v1690_v9 = vpop.eup %1689 }
 0x32c   :  { %vm1205_vm6 = vweird.f32 %v1690_v9 }
 0x32d   :  { %v1044_v52 = vunpack.c.l.b16 %v844_v53  ;;  %v1201_v53 = vmul.f32 32.0, %v1690_v9 }
 0x32f   :  { %v1045_v15 = vpack.c.b16 %v1044_v52, %v1043_v14  ;;  %v1202_v14 = vsub.f32 1.0, %v1201_v53 }
 0x331   :  { %1553 = vmatmul.msk.bf16.vlgmr.msrb.gmra.mxu1 %vm652_vm2, %v1045_v15  ;;  %v1203_v52 = vmul.f32 %v1690_v9, %v1202_v14 }
 0x333   :  { %v1204_v15 = vadd.f32 %v1690_v9, %v1203_v52 }
 0x33e   :  { %v868_v18 = vpop.f32.mrf.mxu2 }
 0x33f   :  { %1069 = vst.msk [vmem:[#allocation3] sm:$0xff] %vm120_vm1, %v868_v18  ;;  %v2214_v18 = vsel %vm1205_vm6, %v1690_v9, %v1204_v15 }
 0x346   :  { %v870_v20 = vpop.f32.mrf.mxu2 }
 0x347   :  { %1070 = vst.msk [vmem:[#allocation3 + $0x8] sm:$0xff] %vm120_vm1, %v870_v20 }
 0x35f   :  { %v924_v21 = vpop.f32.mrf.mxu0 }
 0x360   :  { %1077 = vrot.lane.b32.xlu2 %v924_v21, %s1829_s29 }
 0x364   :  { %v980_v12 = vpop.f32.mrf.mxu2 }
 0x367   :  { %v926_v22 = vpop.f32.mrf.mxu0 }
 0x368   :  { %1079 = vrot.lane.b32.xlu1 %v926_v22, %s1829_s29 }
 0x36c   :  { %v982_v29 = vpop.f32.mrf.mxu2 }
 0x36d   :  { %v896_v23 = vpop.f32.mrf.mxu3  ;;  %1100 = vrot.lane.b32.xlu2 %v982_v29, %s1830_s9 }
 0x36e   :  { %1071 = vst.msk [vmem:[#allocation3 + $0x10] sm:$0xff] %vm120_vm1, %v896_v23 }
 0x36f   :  { %v952_v36 = vpop.f32.mrf.mxu1  ;;  %v1036_v24 = vpop.f32.mrf.mxu0 }
 0x370   :  { %1081 = vrot.lane.b32.xlu0 %v952_v36, %s1829_s29  ;;  %1119 = vrot.lane.b32.xlu1 %v1036_v24, %s1831_s10 }
 0x375   :  { %v898_v25 = vpop.f32.mrf.mxu3 }
 0x376   :  { %1072 = vst.msk [vmem:[#allocation3 + $0x18] sm:$0xff] %vm120_vm1, %v898_v25 }
 0x377   :  { %v1038_v26 = vpop.f32.mrf.mxu0  ;;  %v954_v27 = vpop.f32.mrf.mxu1 }
 0x378   :  { %1098 = vrot.lane.b32.xlu1 %v980_v12, %s1830_s9  ;;  %1121 = vrot.lane.b32.xlu2 %v1038_v26, %s1831_s10 }
 0x380   :  { %1083 = vrot.lane.b32.xlu1 %v954_v27, %s1829_s29 }
 0x383   :  { %v1008_v28 = vpop.f32.mrf.mxu3 }
 0x384   :  { %1102 = vrot.lane.b32.xlu2 %v1008_v28, %s1830_s9 }
 0x38b   :  { %v1010_v30 = vpop.f32.mrf.mxu3 }
 0x38c   :  { %1104 = vrot.lane.b32.xlu1 %v1010_v30, %s1830_s9 }
 0x3ae   :  { %v1064_v62 = vpop.f32.mrf.mxu1 }
 0x3af   :  { %1123 = vrot.lane.b32.xlu2 %v1064_v62, %s1831_s10 }
 0x3b6   :  { %v1066_v32 = vpop.f32.mrf.mxu1 }
 0x3b7   :  { %1125 = vrot.lane.b32.xlu1 %v1066_v32, %s1831_s10 }
 0x3ba   :  { %v1078_v33 = vpop.permute.xlu2 %1077 }
 0x3bb   :  { %1090 = vst.msk [vmem:[#allocation3] sm:$0xff] %vm1089_vm3, %v1078_v33 }
 0x3c7   :  { %v1101_v17 = vpop.permute.xlu2 %1100 }
 0x3d2   :  { %v1122_v60 = vpop.permute.xlu2 %1121 }
 0x3da   :  { %v1080_v43 = vpop.permute.xlu1 %1079 }
 0x3db   :  { %1091 = vst.msk [vmem:[#allocation3 + $0x8] sm:$0xff] %vm1089_vm3, %v1080_v43 }
 0x3dc   :  { %1112 = vst.msk [vmem:[#allocation3 + $0x8] sm:$0xff] %vm1110_vm4, %v1101_v17 }
 0x3dd   :  { %1133 = vst.msk [vmem:[#allocation3 + $0x8] sm:$0xff] %vm1131_vm5, %v1122_v60  ;;  %v1597_v60 = vld [vmem:[#allocation7 + $0x8] sm:$0xff] }
 0x3de   :  { %v1103_v57 = vpop.permute.xlu2 %1102  ;;  %1324 = vmatpush.bf16.msra.mxu3 %v1597_v60 }
 0x3e2   :  { %v1120_v48 = vpop.permute.xlu1 %1119  ;;  %v1082_v37 = vpop.permute.xlu0 %1081 }
 0x3e3   :  { %1092 = vst.msk [vmem:[#allocation3 + $0x10] sm:$0xff] %vm1089_vm3, %v1082_v37 }
 0x3e4   :  { %1113 = vst.msk [vmem:[#allocation3 + $0x10] sm:$0xff] %vm1110_vm4, %v1103_v57  ;;  %v1137_v45 = vld [vmem:[#allocation3 + $0x8] sm:$0xff] }
 0x3ea   :  { %v1099_v31 = vpop.permute.xlu1 %1098 }
 0x3eb   :  { %1111 = vst.msk [vmem:[#allocation3] sm:$0xff] %vm1110_vm4, %v1099_v31  ;;  %v1596_v31 = vld [vmem:[#allocation7] sm:$0xff] }
 0x3ec   :  { %1132 = vst.msk [vmem:[#allocation3] sm:$0xff] %vm1131_vm5, %v1120_v48  ;;  %1325 = vmatpush.bf16.msra.mxu3 %v1596_v31 }
 0x3f2   :  { %v1084_v38 = vpop.permute.xlu1 %1083 }
 0x3f3   :  { %1093 = vst.msk [vmem:[#allocation3 + $0x18] sm:$0xff] %vm1089_vm3, %v1084_v38  ;;  %v1136_v42 = vld [vmem:[#allocation3] sm:$0xff] }
 0x3f4   :  { %v1140_v46 = vpack.c.bf16 %v1137_v45, %v1136_v42 }
 0x3f6   :  { %1562 = vmatmul.msk.bf16.vlgmr.msra.gmra.mxu2 %vm94_vm0, %v1140_v46 }
 0x3fe   :  { %v1105_v39 = vpop.permute.xlu1 %1104 }
 0x3ff   :  { %1114 = vst.msk [vmem:[#allocation3 + $0x18] sm:$0xff] %vm1110_vm4, %v1105_v39  ;;  %vm1376_vm4 = vcmask 523264  }
 0x409   :  { %v1124_v6 = vpop.permute.xlu2 %1123 }
 0x40a   :  { %1134 = vst.msk [vmem:[#allocation3 + $0x10] sm:$0xff] %vm1131_vm5, %v1124_v6 }
 0x411   :  { %v1138_v41 = vld [vmem:[#allocation3 + $0x10] sm:$0xff] }
 0x429   :  { %v1126_v47 = vpop.permute.xlu1 %1125 }
 0x42a   :  { %1135 = vst.msk [vmem:[#allocation3 + $0x18] sm:$0xff] %vm1131_vm5, %v1126_v47 }
 0x431   :  { %v1139_v50 = vld [vmem:[#allocation3 + $0x18] sm:$0xff] }
 0x432   :  { %v1141_v51 = vpack.c.bf16 %v1139_v50, %v1138_v41 }
 0x434   :  { %1563 = vmatmul.msk.bf16.gmra.mxu2 %vm94_vm0, %v1141_v51 }
 0x479   :  { %v1174_v55 = vpop.f32.mrf.mxu2 }
 0x47a   :  { %v1175_v56 = vadd.f32 %v1174_v55, %v1146_v8 }
 0x47c   :  { %v1184_v58 = vadd.f32 %v1708_v34, %v1175_v56 }
 0x47e   :  { %v1188_v59 = vsel %vm94_vm0, %v1184_v58, 0.0 }
 0x47f   :  { %1189 = vadd.xlane.f32.xlu0 %v1188_v59  ;;  %v1283_v59 = vperm.slane %v2195_v2, 3 }
 0x481   :  { %v1176_v10 = vpop.f32.mrf.mxu2 }
 0x482   :  { %v1177_v54 = vadd.f32 %v1176_v10, %v1146_v8 }
 0x484   :  { %v1185_v5 = vadd.f32 %v1709_v61, %v1177_v54 }
 0x486   :  { %v1191_v63 = vsel %vm94_vm0, %v1185_v5, 0.0 }
 0x487   :  { %1192 = vadd.xlane.f32.xlu2 %v1191_v63 }
 0x4b7   :  { %v1179_v0 = vpop.f32.mrf.mxu2 }
 0x4b8   :  { %v1180_v1 = vadd.f32 %v1179_v0, %v1146_v8 }
 0x4ba   :  { %v1186_v4 = vadd.f32 %v1710_v3, %v1180_v1 }
 0x4bc   :  { %v1194_v19 = vsel %vm94_vm0, %v1186_v4, 0.0 }
 0x4bd   :  { %1195 = vadd.xlane.f32.xlu1 %v1194_v19 }
 0x4bf   :  { %v1181_v44 = vpop.f32.mrf.mxu2 }
 0x4c0   :  { %v1182_v7 = vadd.f32 %v1181_v44, %v1146_v8 }
 0x4c2   :  { %v1187_v40 = vadd.f32 %v1711_v11, %v1182_v7 }
 0x4c4   :  { %v1197_v16 = vsel %vm94_vm0, %v1187_v40, 0.0 }
 0x4c5   :  { %1198 = vadd.xlane.f32.xlu0 %v1197_v16 }
 0x4f2   :  { %v1190_v20 = vpop.xlane.xlu0 %1189 }
 0x4f3   :  { %v1207_v21 = vmul.f32 %v2214_v18, %v1190_v20 }
 0x4f5   :  { %v1211_v12 = vsub.f32 %v1184_v58, %v1207_v21 }
 0x4f7   :  { %v1215_v22 = vmul.f32 %v1211_v12, %v1211_v12 }
 0x4f9   :  { %v1219_v29 = vsel %vm94_vm0, %v1215_v22, 0.0 }
 0x4fa   :  { %v1193_v23 = vpop.xlane.xlu2 %1192  ;;  %1220 = vadd.xlane.f32.xlu2 %v1219_v29 }
 0x4fb   :  { %v1208_v36 = vmul.f32 %v2214_v18, %v1193_v23 }
 0x4fd   :  { %v1212_v24 = vsub.f32 %v1185_v5, %v1208_v36  ;;  %v1288_v5 = vperm.slane %v2195_v2, 4 }
 0x4ff   :  { %v1216_v25 = vmul.f32 %v1212_v24, %v1212_v24 }
 0x501   :  { %v1222_v26 = vsel %vm94_vm0, %v1216_v25, 0.0 }
 0x502   :  { %1223 = vadd.xlane.f32.xlu1 %v1222_v26 }
 0x530   :  { %v1196_v27 = vpop.xlane.xlu1 %1195 }
 0x531   :  { %v1209_v28 = vmul.f32 %v2214_v18, %v1196_v27 }
 0x533   :  { %v2221_v30 = vsub.f32 %v1186_v4, %v1209_v28 }
 0x535   :  { %v1217_v62 = vmul.f32 %v2221_v30, %v2221_v30 }
 0x537   :  { %v1225_v32 = vsel %vm94_vm0, %v1217_v62, 0.0 }
 0x538   :  { %1226 = vadd.xlane.f32.xlu0 %v1225_v32  ;;  %v1199_v33 = vpop.xlane.xlu0 %1198 }
 0x539   :  { %v1210_v13 = vmul.f32 %v2214_v18, %v1199_v33 }
 0x53b   :  { %v2227_v35 = vsub.f32 %v1187_v40, %v1210_v13 }
 0x53d   :  { %v1218_v17 = vmul.f32 %v2227_v35, %v2227_v35 }
 0x53f   :  { %v1228_v43 = vsel %vm94_vm0, %v1218_v17, 0.0  ;;  %v1601_v17 = vld [vmem:[%s2304_s4 + $0x18] sm:$0xff] }
 0x540   :  { %1229 = vadd.xlane.f32.xlu2 %v1228_v43  ;;  %1387 = vmatpush.bf16.msra.mxu0 %v1601_v17  ;;  %v1598_v43 = vld [vmem:[%s2304_s4] sm:$0xff] }
 0x56d   :  { %v1221_v48 = vpop.xlane.xlu2 %1220 }
 0x56e   :  { %v1231_v37 = vmul.f32 %v1221_v48, %v2214_v18  ;;  %v1299_v48 = vperm.slane %v2195_v2, 1 }
 0x570   :  { %v1235_v57 = vadd.f32 1e-05, %v1231_v37 }
 0x572   :  { %1691 = vrsqrt.f32 %v1235_v57  ;;  %vm1245_vm8 = vweird.f32 %v1235_v57 }
 0x575   :  { %v1224_v38 = vpop.xlane.xlu1 %1223 }
 0x576   :  { %v1232_v42 = vmul.f32 %v1224_v38, %v2214_v18 }
 0x578   :  { %v1692_v45 = vpop.eup %1691  ;;  %v1236_v46 = vadd.f32 1e-05, %v1232_v42 }
 0x579   :  { %v1240_v39 = vmul.f32 %v1692_v45, %v1235_v57  ;;  %vm1246_vm7 = vweird.f32 %v1692_v45 }
 0x57a   :  { %1693 = vrsqrt.f32 %v1236_v46  ;;  %vm1247_vm9 = vmor %vm1245_vm8, %vm1246_vm7  ;;  %vm1255_vm11 = vweird.f32 %v1236_v46 }
 0x57b   :  { %v1241_v6 = vmul.f32 %v1692_v45, %v1240_v39 }
 0x57d   :  { %v1242_v47 = vmul.f32 0.5, %v1241_v6 }
 0x57f   :  { %v1243_v41 = vsub.f32 1.5, %v1242_v47 }
 0x580   :  { %v1694_v50 = vpop.eup %1693 }
 0x581   :  { %v1244_v51 = vmul.f32 %v1692_v45, %v1243_v41  ;;  %v1250_v8 = vmul.f32 %v1694_v50, %v1236_v46  ;;  %vm1256_vm10 = vweird.f32 %v1694_v50 }
 0x582   :  { %vm1257_vm12 = vmor %vm1255_vm11, %vm1256_vm10 }
 0x583   :  { %v1251_v55 = vmul.f32 %v1694_v50, %v1250_v8  ;;  %v1248_v56 = vsel %vm1247_vm9, %v1692_v45, %v1244_v51  ;;  %v1351_v8 = vperm.slane %v2195_v2, 5 }
 0x584   :  { %v1279_v10 = vmul.f32 %v1248_v56, %v1211_v12 }
 0x585   :  { %v1252_v34 = vmul.f32 0.5, %v1251_v55 }
 0x586   :  { %v1284_v63 = vmul.f32 %v1283_v59, %v1279_v10 }
 0x587   :  { %v1253_v58 = vsub.f32 1.5, %v1252_v34 }
 0x588   :  { %v2236_v3 = vadd.f32 %v1288_v5, %v1284_v63 }
 0x589   :  { %v1254_v54 = vmul.f32 %v1694_v50, %v1253_v58 }
 0x58b   :  { %v1258_v61 = vsel %vm1257_vm12, %v1694_v50, %v1254_v54 }
 0x58c   :  { %v1280_v0 = vmul.f32 %v1258_v61, %v1212_v24 }
 0x58e   :  { %v1285_v1 = vmul.f32 %v1283_v59, %v1280_v0 }
 0x590   :  { %v2238_v4 = vadd.f32 %v1288_v5, %v1285_v1 }
 0x592   :  { %v1293_v19 = vpack.c.bf16 %v2238_v4, %v2236_v3 }
 0x594   :  { %1572 = vmatmul.msk.bf16.vlgmr.msra.gmra.mxu3 %vm94_vm0, %v1293_v19 }
 0x5ab   :  { %v1227_v44 = vpop.xlane.xlu0 %1226 }
 0x5ac   :  { %v1233_v7 = vmul.f32 %v1227_v44, %v2214_v18 }
 0x5ae   :  { %v1237_v11 = vadd.f32 1e-05, %v1233_v7 }
 0x5b0   :  { %1695 = vrsqrt.f32 %v1237_v11  ;;  %vm1265_vm14 = vweird.f32 %v1237_v11 }
 0x5b3   :  { %v1230_v40 = vpop.xlane.xlu2 %1229 }
 0x5b4   :  { %v1234_v16 = vmul.f32 %v1230_v40, %v2214_v18 }
 0x5b6   :  { %v1696_v49 = vpop.eup %1695  ;;  %v1238_v9 = vadd.f32 1e-05, %v1234_v16 }
 0x5b7   :  { %v1260_v53 = vmul.f32 %v1696_v49, %v1237_v11  ;;  %vm1266_vm13 = vweird.f32 %v1696_v49 }
 0x5b8   :  { %1697 = vrsqrt.f32 %v1238_v9  ;;  %vm1267_vm15 = vmor %vm1265_vm14, %vm1266_vm13  ;;  %vm1275_vm2 = vweird.f32 %v1238_v9 }
 0x5b9   :  { %v1261_v14 = vmul.f32 %v1696_v49, %v1260_v53 }
 0x5bb   :  { %v1262_v52 = vmul.f32 0.5, %v1261_v14 }
 0x5bd   :  { %v1263_v15 = vsub.f32 1.5, %v1262_v52 }
 0x5be   :  { %v1698_v20 = vpop.eup %1697 }
 0x5bf   :  { %v1264_v21 = vmul.f32 %v1696_v49, %v1263_v15  ;;  %v1270_v12 = vmul.f32 %v1698_v20, %v1238_v9  ;;  %vm1276_vm1 = vweird.f32 %v1698_v20 }
 0x5c0   :  { %vm1277_vm3 = vmor %vm1275_vm2, %vm1276_vm1 }
 0x5c1   :  { %v1271_v22 = vmul.f32 %v1698_v20, %v1270_v12  ;;  %v1268_v29 = vsel %vm1267_vm15, %v1696_v49, %v1264_v21 }
 0x5c2   :  { %v1281_v24 = vmul.f32 %v1268_v29, %v2221_v30  ;;  %v1600_v30 = vld [vmem:[%s2304_s4 + $0x10] sm:$0xff] }
 0x5c3   :  { %v1272_v23 = vmul.f32 0.5, %v1271_v22  ;;  %1388 = vmatpush.bf16.msra.mxu0 %v1600_v30 }
 0x5c4   :  { %v1286_v28 = vmul.f32 %v1283_v59, %v1281_v24 }
 0x5c5   :  { %v1273_v36 = vsub.f32 1.5, %v1272_v23 }
 0x5c6   :  { %v1291_v32 = vadd.f32 %v1288_v5, %v1286_v28 }
 0x5c7   :  { %v1274_v25 = vmul.f32 %v1698_v20, %v1273_v36 }
 0x5c9   :  { %v1278_v26 = vsel %vm1277_vm3, %v1698_v20, %v1274_v25 }
 0x5ca   :  { %v1282_v27 = vmul.f32 %v1278_v26, %v2227_v35  ;;  %v1599_v35 = vld [vmem:[%s2304_s4 + $0x8] sm:$0xff]  ;;  %s1833_s4 = smov [#allocation10]  }
 0x5cb   :  { %1389 = vmatpush.bf16.msra.mxu0 %v1599_v35  ;;  %s1512_s1 = sshll.u32 %s1833_s4, 4  ;;  %s1513_s1 = int_to_ptr.vmem [resolvable:$true] %s1512_s1 }
 0x5cc   :  { %v1287_v62 = vmul.f32 %v1283_v59, %v1282_v27 }
 0x5ce   :  { %v1292_v33 = vadd.f32 %v1288_v5, %v1287_v62 }
 0x5cf   :  { %1390 = vmatpush.bf16.msra.mxu0 %v1598_v43 }
 0x5d0   :  { %v1294_v13 = vpack.c.bf16 %v1292_v33, %v1291_v32 }
 0x5d2   :  { %1573 = vmatmul.msk.bf16.gmra.mxu3 %vm94_vm0, %v1294_v13 }
 0x617   :  { %v1327_v60 = vpop.f32.mrf.mxu3 }
 0x618   :  { %v1328_v37 = vadd.f32 %v1327_v60, %v1299_v48 }
 0x61a   :  { %v1337_v38 = vmax.f32 %v1328_v37, 0.0 }
 0x61f   :  { %v1329_v57 = vpop.f32.mrf.mxu3 }
 0x620   :  { %v1330_v31 = vadd.f32 %v1329_v57, %v1299_v48 }
 0x622   :  { %v1338_v42 = vmax.f32 %v1330_v31, 0.0  ;;  %v1494_v31 = vperm.slane %v2195_v2, 6 }
 0x624   :  { %v1341_v45 = vpack.c.bf16 %v1338_v42, %v1337_v38 }
 0x626   :  { %1590 = vmatmul.msk.bf16.vlgmr.msra.gmra.mxu0 %vm1376_vm4, %v1341_v45  ;;  %v1499_v45 = vperm.slane %v2195_v2, 7 }
 0x655   :  { %v1332_v46 = vpop.f32.mrf.mxu3 }
 0x656   :  { %v1333_v39 = vadd.f32 %v1332_v46, %v1299_v48 }
 0x658   :  { %v1339_v41 = vmax.f32 %v1333_v39, 0.0 }
 0x65d   :  { %v1334_v6 = vpop.f32.mrf.mxu3 }
 0x65e   :  { %v1335_v47 = vadd.f32 %v1334_v6, %v1299_v48 }
 0x660   :  { %v1340_v50 = vmax.f32 %v1335_v47, 0.0 }
 0x662   :  { %v1342_v51 = vpack.c.bf16 %v1340_v50, %v1339_v41 }
 0x664   :  { %1591 = vmatmul.msk.bf16.gmra.mxu0 %vm1376_vm4, %v1342_v51 }
 0x6a3   :  { %v1392_v55 = vpop.f32.mrf.mxu0 }
 0x6a4   :  { %v1393_v56 = vadd.f32 %v1392_v55, %v1351_v8 }
 0x6a6   :  { %v1402_v34 = vadd.f32 %v1393_v56, %v2236_v3 }
 0x6a8   :  { %v1406_v58 = vsel %vm94_vm0, %v1402_v34, 0.0 }
 0x6a9   :  { %1407 = vadd.xlane.f32.xlu1 %v1406_v58 }
 0x6ab   :  { %v1394_v59 = vpop.f32.mrf.mxu0 }
 0x6ac   :  { %v1395_v10 = vadd.f32 %v1394_v59, %v1351_v8 }
 0x6ae   :  { %v1403_v54 = vadd.f32 %v1395_v10, %v2238_v4 }
 0x6b0   :  { %v1409_v61 = vsel %vm94_vm0, %v1403_v54, 0.0 }
 0x6b1   :  { %1410 = vadd.xlane.f32.xlu0 %v1409_v61 }
 0x6e1   :  { %v1397_v5 = vpop.f32.mrf.mxu0 }
 0x6e2   :  { %v1398_v63 = vadd.f32 %v1397_v5, %v1351_v8 }
 0x6e4   :  { %v1404_v0 = vadd.f32 %v1398_v63, %v1291_v32 }
 0x6e6   :  { %v1412_v1 = vsel %vm94_vm0, %v1404_v0, 0.0 }
 0x6e7   :  { %1413 = vadd.xlane.f32.xlu2 %v1412_v1 }
 0x6e9   :  { %v1399_v19 = vpop.f32.mrf.mxu0 }
 0x6ea   :  { %v1400_v44 = vadd.f32 %v1399_v19, %v1351_v8 }
 0x6ec   :  { %v1405_v7 = vadd.f32 %v1400_v44, %v1292_v33 }
 0x6ee   :  { %v1415_v3 = vsel %vm94_vm0, %v1405_v7, 0.0 }
 0x6ef   :  { %1416 = vadd.xlane.f32.xlu1 %v1415_v3 }
 0x71c   :  { %v1408_v11 = vpop.xlane.xlu1 %1407 }
 0x71d   :  { %v1418_v40 = vmul.f32 %v1408_v11, %v2214_v18 }
 0x71f   :  { %v1422_v16 = vsub.f32 %v1402_v34, %v1418_v40 }
 0x721   :  { %v1426_v4 = vmul.f32 %v1422_v16, %v1422_v16 }
 0x723   :  { %v1430_v49 = vsel %vm94_vm0, %v1426_v4, 0.0 }
 0x724   :  { %1431 = vadd.xlane.f32.xlu0 %v1430_v49  ;;  %v1411_v9 = vpop.xlane.xlu0 %1410 }
 0x725   :  { %v1419_v53 = vmul.f32 %v1411_v9, %v2214_v18 }
 0x727   :  { %v1423_v14 = vsub.f32 %v1403_v54, %v1419_v53 }
 0x729   :  { %v1427_v52 = vmul.f32 %v1423_v14, %v1423_v14 }
 0x72b   :  { %v1433_v15 = vsel %vm94_vm0, %v1427_v52, 0.0 }
 0x72c   :  { %1434 = vadd.xlane.f32.xlu2 %v1433_v15 }
 0x75a   :  { %v1414_v20 = vpop.xlane.xlu2 %1413 }
 0x75b   :  { %v1420_v21 = vmul.f32 %v1414_v20, %v2214_v18 }
 0x75d   :  { %v2273_v12 = vsub.f32 %v1404_v0, %v1420_v21 }
 0x75f   :  { %v1428_v22 = vmul.f32 %v2273_v12, %v2273_v12 }
 0x761   :  { %v1436_v29 = vsel %vm94_vm0, %v1428_v22, 0.0 }
 0x762   :  { %v1417_v23 = vpop.xlane.xlu1 %1416  ;;  %1437 = vadd.xlane.f32.xlu1 %v1436_v29 }
 0x763   :  { %v1421_v36 = vmul.f32 %v1417_v23, %v2214_v18 }
 0x765   :  { %v2279_v24 = vsub.f32 %v1405_v7, %v1421_v36 }
 0x767   :  { %v1429_v25 = vmul.f32 %v2279_v24, %v2279_v24 }
 0x769   :  { %v1439_v26 = vsel %vm94_vm0, %v1429_v25, 0.0 }
 0x76a   :  { %1440 = vadd.xlane.f32.xlu0 %v1439_v26 }
 0x797   :  { %v1432_v27 = vpop.xlane.xlu0 %1431 }
 0x798   :  { %v1442_v28 = vmul.f32 %v1432_v27, %v2214_v18 }
 0x79a   :  { %v1446_v62 = vadd.f32 1e-05, %v1442_v28 }
 0x79c   :  { %1699 = vrsqrt.f32 %v1446_v62  ;;  %vm1456_vm6 = vweird.f32 %v1446_v62 }
 0x79f   :  { %v1435_v32 = vpop.xlane.xlu2 %1434 }
 0x7a0   :  { %v1443_v33 = vmul.f32 %v1435_v32, %v2214_v18 }
 0x7a2   :  { %v1700_v13 = vpop.eup %1699  ;;  %v1447_v17 = vadd.f32 1e-05, %v1443_v33 }
 0x7a3   :  { %v1451_v30 = vmul.f32 %v1700_v13, %v1446_v62  ;;  %vm1457_vm5 = vweird.f32 %v1700_v13 }
 0x7a4   :  { %1701 = vrsqrt.f32 %v1447_v17  ;;  %vm1458_vm7 = vmor %vm1456_vm6, %vm1457_vm5  ;;  %vm1466_vm9 = vweird.f32 %v1447_v17 }
 0x7a5   :  { %v1452_v35 = vmul.f32 %v1700_v13, %v1451_v30 }
 0x7a7   :  { %v1453_v43 = vmul.f32 0.5, %v1452_v35 }
 0x7a9   :  { %v1454_v60 = vsub.f32 1.5, %v1453_v43 }
 0x7aa   :  { %v1702_v48 = vpop.eup %1701 }
 0x7ab   :  { %v1455_v37 = vmul.f32 %v1700_v13, %v1454_v60  ;;  %v1461_v57 = vmul.f32 %v1702_v48, %v1447_v17  ;;  %vm1467_vm8 = vweird.f32 %v1702_v48 }
 0x7ac   :  { %vm1468_vm10 = vmor %vm1466_vm9, %vm1467_vm8 }
 0x7ad   :  { %v1459_v38 = vsel %vm1458_vm7, %v1700_v13, %v1455_v37  ;;  %v1462_v42 = vmul.f32 %v1702_v48, %v1461_v57 }
 0x7ae   :  { %v1490_v46 = vmul.f32 %v1459_v38, %v1422_v16 }
 0x7af   :  { %v1463_v39 = vmul.f32 0.5, %v1462_v42 }
 0x7b0   :  { %v1495_v6 = vmul.f32 %v1494_v31, %v1490_v46 }
 0x7b1   :  { %v1464_v47 = vsub.f32 1.5, %v1463_v39 }
 0x7b2   :  { %v1500_v41 = vadd.f32 %v1499_v45, %v1495_v6 }
 0x7b3   :  { %v1465_v50 = vmul.f32 %v1702_v48, %v1464_v47 }
 0x7b4   :  { %1504 = vst.msk [vmem:[#allocation10] sm:$0xff] %vm94_vm0, %v1500_v41 }
 0x7b5   :  { %v1469_v51 = vsel %vm1468_vm10, %v1702_v48, %v1465_v50 }
 0x7b6   :  { %v1491_v8 = vmul.f32 %v1469_v51, %v1423_v14 }
 0x7b8   :  { %v1496_v55 = vmul.f32 %v1494_v31, %v1491_v8 }
 0x7ba   :  { %v1501_v56 = vadd.f32 %v1499_v45, %v1496_v55 }
 0x7bc   :  { %1505 = vst.msk [vmem:[#allocation10 + $0x8] sm:$0xff] %vm94_vm0, %v1501_v56 }
 0x7d5   :  { %v1438_v34 = vpop.xlane.xlu1 %1437 }
 0x7d6   :  { %v1444_v2 = vmul.f32 %v1438_v34, %v2214_v18 }
 0x7d8   :  { %v1448_v58 = vadd.f32 1e-05, %v1444_v2 }
 0x7da   :  { %1703 = vrsqrt.f32 %v1448_v58  ;;  %vm1476_vm12 = vweird.f32 %v1448_v58 }
 0x7dd   :  { %v1441_v59 = vpop.xlane.xlu0 %1440 }
 0x7de   :  { %v1445_v10 = vmul.f32 %v1441_v59, %v2214_v18 }
 0x7e0   :  { %v1704_v54 = vpop.eup %1703  ;;  %v1449_v61 = vadd.f32 1e-05, %v1445_v10 }
 0x7e1   :  { %v1471_v5 = vmul.f32 %v1704_v54, %v1448_v58  ;;  %vm1477_vm11 = vweird.f32 %v1704_v54 }
 0x7e2   :  { %1705 = vrsqrt.f32 %v1449_v61  ;;  %vm1478_vm13 = vmor %vm1476_vm12, %vm1477_vm11  ;;  %vm1486_vm15 = vweird.f32 %v1449_v61 }
 0x7e3   :  { %v1472_v63 = vmul.f32 %v1704_v54, %v1471_v5 }
 0x7e5   :  { %v1473_v0 = vmul.f32 0.5, %v1472_v63 }
 0x7e7   :  { %v1474_v1 = vsub.f32 1.5, %v1473_v0 }
 0x7e8   :  { %v1706_v19 = vpop.eup %1705 }
 0x7e9   :  { %v1475_v44 = vmul.f32 %v1704_v54, %v1474_v1  ;;  %v1481_v7 = vmul.f32 %v1706_v19, %v1449_v61  ;;  %vm1487_vm14 = vweird.f32 %v1706_v19 }
 0x7ea   :  { %vm1488_vm1 = vmor %vm1486_vm15, %vm1487_vm14 }
 0x7eb   :  { %v1479_v3 = vsel %vm1478_vm13, %v1704_v54, %v1475_v44  ;;  %v1482_v11 = vmul.f32 %v1706_v19, %v1481_v7 }
 0x7ec   :  { %v1492_v40 = vmul.f32 %v1479_v3, %v2273_v12 }
 0x7ed   :  { %v1483_v16 = vmul.f32 0.5, %v1482_v11 }
 0x7ee   :  { %v1497_v4 = vmul.f32 %v1494_v31, %v1492_v40 }
 0x7ef   :  { %v1484_v18 = vsub.f32 1.5, %v1483_v16 }
 0x7f0   :  { %v1502_v49 = vadd.f32 %v1499_v45, %v1497_v4 }
 0x7f1   :  { %v1485_v9 = vmul.f32 %v1706_v19, %v1484_v18 }
 0x7f2   :  { %1506 = vst.msk [vmem:[#allocation10 + $0x10] sm:$0xff] %vm94_vm0, %v1502_v49 }
 0x7f3   :  { %v1489_v53 = vsel %vm1488_vm1, %v1706_v19, %v1485_v9 }
 0x7f4   :  { %v1493_v14 = vmul.f32 %v1489_v53, %v2279_v24 }
 0x7f6   :  { %v1498_v52 = vmul.f32 %v1494_v31, %v1493_v14 }
 0x7f8   :  { %v1503_v15 = vadd.f32 %v1499_v45, %v1498_v52 }
 0x7fa   :  { %1507 = vst.msk [vmem:[#allocation10 + $0x18] sm:$0xff] %vm94_vm0, %v1503_v15 }
 0x7fb   :  { %1520 = dma.vmem_to_hbm [thread:$0]  %s1513_s1, 512, %s1515_s25, [#allocation6], %s1834_s26, %s1834_s26, %s1829_s29  }
 0x7fc   :  { %1812 = dma.done.wait [#allocation6], 512  }
 0x7fd   :  { %1813 = vsyncadd [#allocation6], 4294966784 }
 0x7fe   :  { %1525 = vsyncpa [#allocation5], 1 }
 0x7ff   :  { %1526 = vsyncpa [#allocation8], 1 }
 0x800   :  { %1527 = vsyncpa [#allocation6], 1 }

</bundles_post_ra>
